<compile_context>
chip_gen: v7x
topology: tpu7x:2x2x1
jax: 0.10.0
libtpu: 0.0.40
codegen_flags: <defaults>
</compile_context>

<pallas_src>
import functools

import jax
import jax.numpy as jnp
from jax import lax
from jax.experimental import pallas as pl
from jax.experimental.pallas import tpu as pltpu

EPS = 1e-5


# ---------------------------------------------------------------------------
# In-kernel helpers
# ---------------------------------------------------------------------------
def _fold_bn(stats_ref, g_ref, b_ref, inv_m):
    """Reduce per-tile (sum, sum_sq) partials and fold gamma/beta into
    per-channel (scale, shift) columns so that bn(y) = y * scale + shift."""
    s = jnp.sum(stats_ref[...], axis=0)                 # (C, 2) f32
    mu = s[:, 0:1] * inv_m
    var = s[:, 1:2] * inv_m - mu * mu                    # single-pass E[y^2]-mu^2
    scale = g_ref[...] * lax.rsqrt(var + EPS)            # (C, 1)
    shift = b_ref[...] - mu * scale
    return scale, shift


def _emit_stats(stats_ref, y):
    """Per-tile BN partials, written with two slice stores (no concatenate)."""
    stats_ref[0, :, 0:1] = jnp.sum(y, axis=1, keepdims=True)
    stats_ref[0, :, 1:2] = jnp.sum(y * y, axis=1, keepdims=True)


# ---------------------------------------------------------------------------
# Stage kernels
# ---------------------------------------------------------------------------
def _conv1_kernel(x_ref, w1t_ref, y_ref, stats_ref):
    """conv1 (1x1): y = w1^T @ x  (bf16 MXU, f32 acc) + per-tile BN partials."""
    x = x_ref[...].astype(jnp.bfloat16)                              # (Cin, TM)
    y = jnp.dot(w1t_ref[...], x, preferred_element_type=jnp.float32)  # (C, TM) f32
    y_ref[...] = y.astype(y_ref.dtype)
    _emit_stats(stats_ref, y)


def _conv2_kernel(y1_ref, w2f_ref, stats1_ref, g_ref, b_ref, mask_ref,
                  y_ref, stats_ref, im_ref, *, W, inv_m):
    """bn1 (folded, finalized in-kernel) + relu + conv2 (3x3) as ONE im2col
    matmul with K = 9*C, plus per-image BN partials.  One image per step."""
    C, HW = y1_ref.shape

    # Finalize bn1 from global partial sums (tiny; recomputed every step so it
    # stays correct when the parallel grid axis is sharded across cores).
    scale, shift = _fold_bn(stats1_ref, g_ref, b_ref, inv_m)

    # bn1 + relu in f32.
    a = jnp.maximum(y1_ref[...].astype(jnp.float32) * scale + shift, 0.0)   # (C, HW)

    # Zero-padded copy along the flattened (h*W + w) axis: handles the
    # h-boundary zeros of the 3x3 conv.  P = W + 1 covers the largest shift.
    P = W + 1
    z = jnp.zeros((C, P), jnp.float32)
    a_pad = jnp.concatenate([z, a, z], axis=1)                              # (C, HW + 2P)

    mask_l = mask_ref[0:1, :]            # zeroes w == 0     columns (kw == 0 taps)
    mask_r = mask_ref[1:2, :]            # zeroes w == W - 1 columns (kw == 2 taps)

    # Write the 9 shifted taps into the (9C, HW) bf16 scratch with
    # sublane-aligned static slice stores; lane-dense, no concatenate.
    for t in range(9):
        kh, kw = t // 3, t % 3
        off = P + (kh - 1) * W + (kw - 1)
        tap = a_pad[:, off:off + HW]
        if kw == 0:
            tap = tap * mask_l
        elif kw == 2:
            tap = tap * mask_r
        im_ref[t * C:(t + 1) * C, :] = tap.astype(im_ref.dtype)

    y = jnp.dot(w2f_ref[...], im_ref[...],
                preferred_element_type=jnp.float32)                          # (C, HW) f32
    y_ref[...] = y.astype(y_ref.dtype)
    _emit_stats(stats_ref, y)


def _conv3_kernel(y2_ref, w3t_ref, stats2_ref, g_ref, b_ref,
                  y_ref, stats_ref, *, inv_m):
    """bn2 (folded, in-kernel finalize) + relu + conv3 (1x1 expansion) + partials."""
    scale, shift = _fold_bn(stats2_ref, g_ref, b_ref, inv_m)
    a = jnp.maximum(y2_ref[...].astype(jnp.float32) * scale + shift, 0.0)
    y = jnp.dot(w3t_ref[...], a.astype(jnp.bfloat16),
                preferred_element_type=jnp.float32)                          # (Cout, TM)
    y_ref[...] = y.astype(y_ref.dtype)
    _emit_stats(stats_ref, y)


def _residual_kernel(y3_ref, x_ref, stats3_ref, g_ref, b_ref, out_ref, *, inv_m):
    """bn3 (folded, in-kernel finalize) + identity residual + relu."""
    scale, shift = _fold_bn(stats3_ref, g_ref, b_ref, inv_m)
    y = y3_ref[...].astype(jnp.float32) * scale + shift
    out = jnp.maximum(y + x_ref[...].astype(jnp.float32), 0.0)
    out_ref[...] = out.astype(out_ref.dtype)


# ---------------------------------------------------------------------------
# Host-side wrapper
# ---------------------------------------------------------------------------
def _bottleneck_cm(x_t, params, N, H, W):
    """x_t: (Cin, M) f32, channel-major / space(n,h,w)-in-lanes layout."""
    w1, w2, w3, g1, b1, g2, b2, g3, b3 = params
    Cin = w1.shape[0]
    C = w1.shape[1]
    Cout = w3.shape[1]
    M = N * H * W
    HW = H * W
    inv_m = 1.0 / float(M)

    # Lane-dense tiling requirements for this toy implementation.
    TM = 128
    assert M % TM == 0, "M = N*H*W must be a multiple of 128"
    assert HW % 128 == 0, "H*W must be a multiple of 128 (see H-row-tiling TODO)"
    T1 = M // TM

    # Weights (bf16, transposed so the contraction dim is on lanes of the LHS).
    w1t = jnp.transpose(w1).astype(jnp.bfloat16)                       # (C, Cin)
    w2f = jnp.transpose(w2, (3, 0, 1, 2)).reshape(C, 9 * C).astype(jnp.bfloat16)
    w3t = jnp.transpose(w3).astype(jnp.bfloat16)                       # (Cout, C)

    # Per-channel BN params as (C, 1) columns (broadcast over lanes).
    g1c = g1.reshape(-1, 1).astype(jnp.float32)
    b1c = b1.reshape(-1, 1).astype(jnp.float32)
    g2c = g2.reshape(-1, 1).astype(jnp.float32)
    b2c = b2.reshape(-1, 1).astype(jnp.float32)
    g3c = g3.reshape(-1, 1).astype(jnp.float32)
    b3c = b3.reshape(-1, 1).astype(jnp.float32)

    # Precomputed 0/1 lane masks for the conv2 w-boundary (left / right taps).
    w_idx = jnp.arange(HW, dtype=jnp.int32) % W
    masks = jnp.stack([(w_idx > 0), (w_idx < W - 1)]).astype(jnp.float32)   # (2, HW)

    cp = pltpu.CompilerParams(dimension_semantics=("parallel",))

    # ---- stage 1: conv1 (1x1) + BN partials, grid over M-tiles -------------
    y1, p1 = pl.pallas_call(
        _conv1_kernel,
        grid=(T1,),
        in_specs=[pl.BlockSpec((Cin, TM), lambda i: (0, i)),
                  pl.BlockSpec((C, Cin), lambda i: (0, 0))],
        out_specs=(pl.BlockSpec((C, TM), lambda i: (0, i)),
                   pl.BlockSpec((1, C, 2), lambda i: (i, 0, 0))),
        out_shape=(jax.ShapeDtypeStruct((C, M), jnp.bfloat16),
                   jax.ShapeDtypeStruct((T1, C, 2), jnp.float32)),
        compiler_params=cp,
    )(x_t, w1t)

    # ---- stage 2: bn1 + relu + conv2 (3x3 via scratch im2col), per image ----
    conv2 = functools.partial(_conv2_kernel, W=W, inv_m=inv_m)
    y2, p2 = pl.pallas_call(
        conv2,
        grid=(N,),
        in_specs=[pl.BlockSpec((C, HW), lambda n: (0, n)),
                  pl.BlockSpec((C, 9 * C), lambda n: (0, 0)),
                  pl.BlockSpec((T1, C, 2), lambda n: (0, 0, 0)),
                  pl.BlockSpec((C, 1), lambda n: (0, 0)),
                  pl.BlockSpec((C, 1), lambda n: (0, 0)),
                  pl.BlockSpec((2, HW), lambda n: (0, 0))],
        out_specs=(pl.BlockSpec((C, HW), lambda n: (0, n)),
                   pl.BlockSpec((1, C, 2), lambda n: (n, 0, 0))),
        out_shape=(jax.ShapeDtypeStruct((C, M), jnp.bfloat16),
                   jax.ShapeDtypeStruct((N, C, 2), jnp.float32)),
        scratch_shapes=[pltpu.VMEM((9 * C, HW), jnp.bfloat16)],
        compiler_params=cp,
    )(y1, w2f, p1, g1c, b1c, masks)

    # ---- stage 3: bn2 + relu + conv3 (1x1 expansion), grid over M-tiles -----
    conv3 = functools.partial(_conv3_kernel, inv_m=inv_m)
    y3, p3 = pl.pallas_call(
        conv3,
        grid=(T1,),
        in_specs=[pl.BlockSpec((C, TM), lambda i: (0, i)),
                  pl.BlockSpec((Cout, C), lambda i: (0, 0)),
                  pl.BlockSpec((N, C, 2), lambda i: (0, 0, 0)),
                  pl.BlockSpec((C, 1), lambda i: (0, 0)),
                  pl.BlockSpec((C, 1), lambda i: (0, 0))],
        out_specs=(pl.BlockSpec((Cout, TM), lambda i: (0, i)),
                   pl.BlockSpec((1, Cout, 2), lambda i: (i, 0, 0))),
        out_shape=(jax.ShapeDtypeStruct((Cout, M), jnp.bfloat16),
                   jax.ShapeDtypeStruct((T1, Cout, 2), jnp.float32)),
        compiler_params=cp,
    )(y2, w3t, p2, g2c, b2c)

    # ---- stage 4: bn3 + identity residual + relu, grid over M-tiles ---------
    res = functools.partial(_residual_kernel, inv_m=inv_m)
    out_t = pl.pallas_call(
        res,
        grid=(T1,),
        in_specs=[pl.BlockSpec((Cout, TM), lambda i: (0, i)),
                  pl.BlockSpec((Cin, TM), lambda i: (0, i)),
                  pl.BlockSpec((T1, Cout, 2), lambda i: (0, 0, 0)),
                  pl.BlockSpec((Cout, 1), lambda i: (0, 0)),
                  pl.BlockSpec((Cout, 1), lambda i: (0, 0))],
        out_specs=pl.BlockSpec((Cout, TM), lambda i: (0, i)),
        out_shape=jax.ShapeDtypeStruct((Cout, M), jnp.float32),
        compiler_params=cp,
    )(y3, x_t, p3, g3c, b3c)
    return out_t


@jax.jit
def bottleneck_forward(x_nchw, params):
    """Public API matches the PyTorch module (NCHW input/output).  The Pallas
    pipeline runs channel-major (C, N*H*W); in an end-to-end net that keeps
    this layout the boundary transposes below disappear."""
    w1, w3 = params[0], params[2]
    N, Cin, H, W = x_nchw.shape
    Cout = w3.shape[1]
    assert Cout == Cin, "identity residual requires in_channels == 4*out_channels"
    M = N * H * W
    x_t = jnp.transpose(x_nchw, (1, 0, 2, 3)).reshape(Cin, M).astype(jnp.float32)
    out_t = _bottleneck_cm(x_t, params, N, H, W)
    return jnp.transpose(out_t.reshape(Cout, N, H, W), (1, 0, 2, 3))


# ---------------------------------------------------------------------------
# References
# ---------------------------------------------------------------------------
def bottleneck_reference_matched(x_nchw, params):
    """Pure-JAX replica of the kernel's exact precision policy (bf16 matmul
    inputs / bf16 HBM intermediates, f32 accumulation & BN math, single-pass
    E[y^2]-mu^2 stats from the f32 conv outputs).  Run eagerly."""
    w1, w2, w3, g1, b1, g2, b2, g3, b3 = params
    bf = jnp.bfloat16
    N, Cin, H, W = x_nchw.shape
    C = w1.shape[1]
    Cout = w3.shape[1]
    M = N * H * W
    xt = jnp.transpose(x_nchw, (1, 0, 2, 3)).reshape(Cin, M).astype(jnp.float32)

    def fold(y, g, b):
        mu = jnp.mean(y, axis=1, keepdims=True)
        var = jnp.mean(y * y, axis=1, keepdims=True) - mu * mu
        scale = g.reshape(-1, 1) * lax.rsqrt(var + EPS)
        return scale, b.reshape(-1, 1) - mu * scale

    # conv1
    y1 = jnp.dot(jnp.transpose(w1).astype(bf), xt.astype(bf),
                 preferred_element_type=jnp.float32)
    sc1, sh1 = fold(y1, g1, b1)
    a1 = jnp.maximum(y1.astype(bf).astype(jnp.float32) * sc1 + sh1, 0.0)
    # conv2 (im2col, same tap order as the kernel)
    a1i = a1.reshape(C, N, H, W)
    a1p = jnp.pad(a1i, ((0, 0), (0, 0), (1, 1), (1, 1)))
    cols = jnp.concatenate([a1p[:, :, kh:kh + H, kw:kw + W]
                            for kh in range(3) for kw in range(3)], axis=0)
    w2f = jnp.transpose(w2, (3, 0, 1, 2)).reshape(C, 9 * C).astype(bf)
    y2 = jnp.dot(w2f, cols.reshape(9 * C, M).astype(bf),
                 preferred_element_type=jnp.float32)
    sc2, sh2 = fold(y2, g2, b2)
    a2 = jnp.maximum(y2.astype(bf).astype(jnp.float32) * sc2 + sh2, 0.0)
    # conv3
    y3 = jnp.dot(jnp.transpose(w3).astype(bf), a2.astype(bf),
                 preferred_element_type=jnp.float32)
    sc3, sh3 = fold(y3, g3, b3)
    out = jnp.maximum(y3.astype(bf).astype(jnp.float32) * sc3 + sh3 + xt, 0.0)
    return jnp.transpose(out.reshape(Cout, N, H, W), (1, 0, 2, 3))


def bottleneck_reference_f32(x_nchw, params):
    """Full-f32 reference mirroring the PyTorch module forward (training BN)."""
    w1, w2, w3, g1, b1, g2, b2, g3, b3 = params
    x = x_nchw.astype(jnp.float32)

    def bn(y, g, b):
        mu = jnp.mean(y, axis=(0, 2, 3), keepdims=True)
        var = jnp.mean((y - mu) ** 2, axis=(0, 2, 3), keepdims=True)
        return (y - mu) * lax.rsqrt(var + EPS) * g.reshape(1, -1, 1, 1) \
            + b.reshape(1, -1, 1, 1)

    y = jnp.einsum('nchw,cd->ndhw', x, w1)
    y = jax.nn.relu(bn(y, g1, b1))
    y = lax.conv_general_dilated(y, w2, (1, 1), 'SAME',
                                 dimension_numbers=('NCHW', 'HWIO', 'NCHW'))
    y = jax.nn.relu(bn(y, g2, b2))
    y = jnp.einsum('nchw,cd->ndhw', y, w3)
    y = bn(y, g3, b3)
    return jax.nn.relu(y + x)


# ---------------------------------------------------------------------------
if __name__ == "__main__":
    # Shapes consistent with the module: identity residual requires
    # in_channels == expansion * out_channels (= 4*C); stride=1, downsample=None.
    N, Cin, H, W = 4, 64, 16, 16
    C = Cin // 4                       # bottleneck width = 16
    Cout = 4 * C                       # = 64

    key = jax.random.PRNGKey(0)
    k = jax.random.split(key, 10)
    x = jax.random.normal(k[0], (N, Cin, H, W), jnp.float32)

    w1 = jax.random.normal(k[1], (Cin, C), jnp.float32) * 0.1       # conv1 1x1 [Cin->C]
    w2 = jax.random.normal(k[2], (3, 3, C, C), jnp.float32) * 0.1   # conv2 3x3 HWIO
    w3 = jax.random.normal(k[3], (C, Cout), jnp.float32) * 0.1      # conv3 1x1 [C->4C]
    g1 = 1.0 + 0.1 * jax.random.normal(k[4], (C,), jnp.float32)
    b1 = 0.1 * jax.random.normal(k[5], (C,), jnp.float32)
    g2 = 1.0 + 0.1 * jax.random.normal(k[6], (C,), jnp.float32)
    b2 = 0.1 * jax.random.normal(k[7], (C,), jnp.float32)
    g3 = 1.0 + 0.1 * jax.random.normal(k[8], (Cout,), jnp.float32)
    b3 = 0.1 * jax.random.normal(k[9], (Cout,), jnp.float32)
    params = (w1, w2, w3, g1, b1, g2, b2, g3, b3)

    out = jax.block_until_ready(bottleneck_forward(x, params))
    assert out.shape == (N, Cout, H, W)

    # Strict check: pure-JAX replica of the kernel's exact precision policy.
    ref_m = jax.block_until_ready(bottleneck_reference_matched(x, params))
    err_m = float(jnp.max(jnp.abs(out - ref_m)))
    assert err_m < 5e-3, f"matched-precision max err {err_m}"

    # Semantic check vs. the full-f32 PyTorch-style reference (remaining
    # difference is bf16 matmul / intermediate rounding only).
    ref_f = jax.block_until_ready(bottleneck_reference_f32(x, params))
    err_f = float(jnp.max(jnp.abs(out - ref_f)))
    assert err_f < 2e-1, f"f32-semantics max err {err_f}"

    print("KERNEL_OK")
</pallas_src>

<mosaic_0001>
module attributes {stable_mosaic.version = 11 : i64} {
  func.func @_conv1_kernel(%arg0: i32, %arg1: memref<64x128xf32, #tpu.memory_space<vmem>>, %arg2: memref<16x64xbf16, #tpu.memory_space<vmem>>, %arg3: memref<16x128xbf16, #tpu.memory_space<vmem>>, %arg4: memref<1x16x2xf32, #tpu.memory_space<vmem>>) attributes {dimension_semantics = [#tpu.dimension_semantics<parallel>], iteration_bounds = array<i64: 8>, scalar_prefetch = 0 : i64, scratch_operands = 0 : i64, tpu.core_type = #tpu.core_type<tc>, window_params = [{transform_indices = @transform_0, window_bounds = array<i64: 64, 128>}, {pipeline_mode = #tpu.pipeline_mode<synchronous>, transform_indices = @transform_1, window_bounds = array<i64: 16, 64>}, {transform_indices = @transform_2, window_bounds = array<i64: 16, 128>}, {transform_indices = @transform_3, window_bounds = array<i64: 1, 16, 2>}]} {
    %c0 = arith.constant 0 : index
    %c0_0 = arith.constant 0 : index
    %0 = vector.load %arg1[%c0, %c0_0] : memref<64x128xf32, #tpu.memory_space<vmem>>, vector<64x128xf32>
    %1 = arith.truncf %0 : vector<64x128xf32> to vector<64x128xbf16>
    %c0_1 = arith.constant 0 : index
    %c0_2 = arith.constant 0 : index
    %2 = vector.load %arg2[%c0_1, %c0_2] : memref<16x64xbf16, #tpu.memory_space<vmem>>, vector<16x64xbf16>
    %cst = arith.constant dense<0.000000e+00> : vector<16x128xf32>
    %3 = tpu.matmul %2, %1, %cst {dimension_numbers = #tpu.dot_dimension_numbers<[1], [0], [0], [1], [0, 0, 1, 1], [], []>} : vector<16x64xbf16>, vector<64x128xbf16>, vector<16x128xf32> -> vector<16x128xf32>
    %4 = arith.truncf %3 : vector<16x128xf32> to vector<16x128xbf16>
    %c0_3 = arith.constant 0 : index
    %c0_4 = arith.constant 0 : index
    %5 = vector.load %arg3[%c0_3, %c0_4] : memref<16x128xbf16, #tpu.memory_space<vmem>>, vector<16x128xbf16>
    tpu.vector_store %arg3[%c0_3, %c0_4], %4 {strides = array<i32>} : memref<16x128xbf16, #tpu.memory_space<vmem>>, vector<16x128xbf16>,
    %cst_5 = arith.constant dense<0.000000e+00> : vector<16xf32>
    %6 = vector.multi_reduction <add>, %3, %cst_5 [1] : vector<16x128xf32> to vector<16xf32>
    %7 = vector.shape_cast %6 : vector<16xf32> to vector<16x1xf32>
    %c0_6 = arith.constant 0 : index
    %c0_7 = arith.constant 0 : index
    %c0_8 = arith.constant 0 : index
    %8 = vector.load %arg4[%c0_6, %c0_7, %c0_8] : memref<1x16x2xf32, #tpu.memory_space<vmem>>, vector<1x16x1xf32>
    %9 = vector.shape_cast %8 : vector<1x16x1xf32> to vector<16x1xf32>
    %10 = vector.shape_cast %7 : vector<16x1xf32> to vector<1x16x1xf32>
    tpu.vector_store %arg4[%c0_6, %c0_7, %c0_8], %10 {strides = array<i32>} : memref<1x16x2xf32, #tpu.memory_space<vmem>>, vector<1x16x1xf32>,
    %11 = arith.mulf %3, %3 : vector<16x128xf32>
    %cst_9 = arith.constant dense<0.000000e+00> : vector<16xf32>
    %12 = vector.multi_reduction <add>, %11, %cst_9 [1] : vector<16x128xf32> to vector<16xf32>
    %13 = vector.shape_cast %12 : vector<16xf32> to vector<16x1xf32>
    %c0_10 = arith.constant 0 : index
    %c0_11 = arith.constant 0 : index
    %c1 = arith.constant 1 : index
    %14 = vector.load %arg4[%c0_10, %c0_11, %c1] : memref<1x16x2xf32, #tpu.memory_space<vmem>>, vector<1x16x1xf32>
    %15 = vector.shape_cast %14 : vector<1x16x1xf32> to vector<16x1xf32>
    %16 = vector.shape_cast %13 : vector<16x1xf32> to vector<1x16x1xf32>
    tpu.vector_store %arg4[%c0_10, %c0_11, %c1], %16 {strides = array<i32>} : memref<1x16x2xf32, #tpu.memory_space<vmem>>, vector<1x16x1xf32>,
    return
  }
  func.func @transform_0(%arg0: i32) -> (i32, i32) {
    %c0_i32 = arith.constant 0 : i32
    %c0_i32_0 = arith.constant 0 : i32
    return %c0_i32, %arg0 : i32, i32
  }
  func.func @transform_1(%arg0: i32) -> (i32, i32) {
    %c0_i32 = arith.constant 0 : i32
    %c0_i32_0 = arith.constant 0 : i32
    %c0_i32_1 = arith.constant 0 : i32
    return %c0_i32, %c0_i32_0 : i32, i32
  }
  func.func @transform_2(%arg0: i32) -> (i32, i32) {
    %c0_i32 = arith.constant 0 : i32
    %c0_i32_0 = arith.constant 0 : i32
    return %c0_i32, %arg0 : i32, i32
  }
  func.func @transform_3(%arg0: i32) -> (i32, i32, i32) {
    %c0_i32 = arith.constant 0 : i32
    %c0_i32_0 = arith.constant 0 : i32
    %c0_i32_1 = arith.constant 0 : i32
    return %arg0, %c0_i32, %c0_i32_0 : i32, i32, i32
  }
}

module attributes {stable_mosaic.version = 11 : i64} {
  func.func @_conv2_kernel(%arg0: i32, %arg1: memref<16x256xbf16, #tpu.memory_space<vmem>>, %arg2: memref<16x144xbf16, #tpu.memory_space<vmem>>, %arg3: memref<8x16x2xf32, #tpu.memory_space<vmem>>, %arg4: memref<16x1xf32, #tpu.memory_space<vmem>>, %arg5: memref<16x1xf32, #tpu.memory_space<vmem>>, %arg6: memref<2x256xf32, #tpu.memory_space<vmem>>, %arg7: memref<16x256xbf16, #tpu.memory_space<vmem>>, %arg8: memref<1x16x2xf32, #tpu.memory_space<vmem>>, %arg9: memref<144x256xbf16, #tpu.memory_space<vmem>>) attributes {dimension_semantics = [#tpu.dimension_semantics<parallel>], iteration_bounds = array<i64: 4>, scalar_prefetch = 0 : i64, scratch_operands = 1 : i64, tpu.core_type = #tpu.core_type<tc>, window_params = [{transform_indices = @transform_0, window_bounds = array<i64: 16, 256>}, {pipeline_mode = #tpu.pipeline_mode<synchronous>, transform_indices = @transform_1, window_bounds = array<i64: 16, 144>}, {pipeline_mode = #tpu.pipeline_mode<synchronous>, transform_indices = @transform_2, window_bounds = array<i64: 8, 16, 2>}, {pipeline_mode = #tpu.pipeline_mode<synchronous>, transform_indices = @transform_3, window_bounds = array<i64: 16, 1>}, {pipeline_mode = #tpu.pipeline_mode<synchronous>, transform_indices = @transform_4, window_bounds = array<i64: 16, 1>}, {pipeline_mode = #tpu.pipeline_mode<synchronous>, transform_indices = @transform_5, window_bounds = array<i64: 2, 256>}, {transform_indices = @transform_6, window_bounds = array<i64: 16, 256>}, {transform_indices = @transform_7, window_bounds = array<i64: 1, 16, 2>}]} {
    %c0 = arith.constant 0 : index
    %c0_0 = arith.constant 0 : index
    %c0_1 = arith.constant 0 : index
    %0 = vector.load %arg3[%c0, %c0_0, %c0_1] : memref<8x16x2xf32, #tpu.memory_space<vmem>>, vector<8x16x2xf32>
    %cst = arith.constant dense<0.000000e+00> : vector<16x2xf32>
    %1 = vector.multi_reduction <add>, %0, %cst [0] : vector<8x16x2xf32> to vector<16x2xf32>
    %2 = vector.extract_strided_slice %1 {offsets = [0, 0], sizes = [16, 1], strides = [1, 1]} : vector<16x2xf32> to vector<16x1xf32>
    %cst_2 = arith.constant 9.765625E-4 : f32
    %3 = vector.broadcast %cst_2 : f32 to vector<16x1xf32>
    %4 = arith.mulf %2, %3 : vector<16x1xf32>
    %5 = vector.extract_strided_slice %1 {offsets = [0, 1], sizes = [16, 1], strides = [1, 1]} : vector<16x2xf32> to vector<16x1xf32>
    %cst_3 = arith.constant 9.765625E-4 : f32
    %6 = vector.broadcast %cst_3 : f32 to vector<16x1xf32>
    %7 = arith.mulf %5, %6 : vector<16x1xf32>
    %8 = arith.mulf %4, %4 : vector<16x1xf32>
    %9 = arith.subf %7, %8 : vector<16x1xf32>
    %c0_4 = arith.constant 0 : index
    %c0_5 = arith.constant 0 : index
    %10 = vector.load %arg4[%c0_4, %c0_5] : memref<16x1xf32, #tpu.memory_space<vmem>>, vector<16x1xf32>
    %cst_6 = arith.constant 9.99999974E-6 : f32
    %11 = vector.broadcast %cst_6 : f32 to vector<16x1xf32>
    %12 = arith.addf %9, %11 : vector<16x1xf32>
    %13 = math.rsqrt %12 : vector<16x1xf32>
    %14 = arith.mulf %10, %13 : vector<16x1xf32>
    %c0_7 = arith.constant 0 : index
    %c0_8 = arith.constant 0 : index
    %15 = vector.load %arg5[%c0_7, %c0_8] : memref<16x1xf32, #tpu.memory_space<vmem>>, vector<16x1xf32>
    %16 = arith.mulf %4, %14 : vector<16x1xf32>
    %17 = arith.subf %15, %16 : vector<16x1xf32>
    %c0_9 = arith.constant 0 : index
    %c0_10 = arith.constant 0 : index
    %18 = vector.load %arg1[%c0_9, %c0_10] : memref<16x256xbf16, #tpu.memory_space<vmem>>, vector<16x256xbf16>
    %19 = arith.extf %18 : vector<16x256xbf16> to vector<16x256xf32>
    %20 = vector.broadcast %14 : vector<16x1xf32> to vector<16x256xf32>
    %21 = arith.mulf %19, %20 : vector<16x256xf32>
    %22 = vector.broadcast %17 : vector<16x1xf32> to vector<16x256xf32>
    %23 = arith.addf %21, %22 : vector<16x256xf32>
    %cst_11 = arith.constant 0.000000e+00 : f32
    %24 = vector.broadcast %cst_11 : f32 to vector<16x256xf32>
    %25 = arith.maximumf %23, %24 : vector<16x256xf32>
    %cst_12 = arith.constant 0.000000e+00 : f32
    %26 = vector.broadcast %cst_12 : f32 to vector<16x17xf32>
    %27 = tpu.concatenate %26, %25, %26 in 1 : vector<16x17xf32>, vector<16x256xf32>, vector<16x17xf32> -> vector<16x290xf32>
    %c0_13 = arith.constant 0 : index
    %c0_14 = arith.constant 0 : index
    %28 = vector.load %arg6[%c0_13, %c0_14] : memref<2x256xf32, #tpu.memory_space<vmem>>, vector<1x256xf32>
    %c1 = arith.constant 1 : index
    %c0_15 = arith.constant 0 : index
    %29 = vector.load %arg6[%c1, %c0_15] : memref<2x256xf32, #tpu.memory_space<vmem>>, vector<1x256xf32>
    %30 = vector.extract_strided_slice %27 {offsets = [0, 0], sizes = [16, 256], strides = [1, 1]} : vector<16x290xf32> to vector<16x256xf32>
    %31 = vector.broadcast %28 : vector<1x256xf32> to vector<16x256xf32>
    %32 = arith.mulf %30, %31 : vector<16x256xf32>
    %33 = arith.truncf %32 : vector<16x256xf32> to vector<16x256xbf16>
    %c0_16 = arith.constant 0 : index
    %c0_17 = arith.constant 0 : index
    %34 = vector.load %arg9[%c0_16, %c0_17] : memref<144x256xbf16, #tpu.memory_space<vmem>>, vector<16x256xbf16>
    tpu.vector_store %arg9[%c0_16, %c0_17], %33 {strides = array<i32>} : memref<144x256xbf16, #tpu.memory_space<vmem>>, vector<16x256xbf16>,
    %35 = vector.extract_strided_slice %27 {offsets = [0, 1], sizes = [16, 256], strides = [1, 1]} : vector<16x290xf32> to vector<16x256xf32>
    %36 = arith.truncf %35 : vector<16x256xf32> to vector<16x256xbf16>
    %c16 = arith.constant 16 : index
    %c0_18 = arith.constant 0 : index
    %37 = vector.load %arg9[%c16, %c0_18] : memref<144x256xbf16, #tpu.memory_space<vmem>>, vector<16x256xbf16>
    tpu.vector_store %arg9[%c16, %c0_18], %36 {strides = array<i32>} : memref<144x256xbf16, #tpu.memory_space<vmem>>, vector<16x256xbf16>,
    %38 = vector.extract_strided_slice %27 {offsets = [0, 2], sizes = [16, 256], strides = [1, 1]} : vector<16x290xf32> to vector<16x256xf32>
    %39 = vector.broadcast %29 : vector<1x256xf32> to vector<16x256xf32>
    %40 = arith.mulf %38, %39 : vector<16x256xf32>
    %41 = arith.truncf %40 : vector<16x256xf32> to vector<16x256xbf16>
    %c32 = arith.constant 32 : index
    %c0_19 = arith.constant 0 : index
    %42 = vector.load %arg9[%c32, %c0_19] : memref<144x256xbf16, #tpu.memory_space<vmem>>, vector<16x256xbf16>
    tpu.vector_store %arg9[%c32, %c0_19], %41 {strides = array<i32>} : memref<144x256xbf16, #tpu.memory_space<vmem>>, vector<16x256xbf16>,
    %43 = vector.extract_strided_slice %27 {offsets = [0, 16], sizes = [16, 256], strides = [1, 1]} : vector<16x290xf32> to vector<16x256xf32>
    %44 = vector.broadcast %28 : vector<1x256xf32> to vector<16x256xf32>
    %45 = arith.mulf %43, %44 : vector<16x256xf32>
    %46 = arith.truncf %45 : vector<16x256xf32> to vector<16x256xbf16>
    %c48 = arith.constant 48 : index
    %c0_20 = arith.constant 0 : index
    %47 = vector.load %arg9[%c48, %c0_20] : memref<144x256xbf16, #tpu.memory_space<vmem>>, vector<16x256xbf16>
    tpu.vector_store %arg9[%c48, %c0_20], %46 {strides = array<i32>} : memref<144x256xbf16, #tpu.memory_space<vmem>>, vector<16x256xbf16>,
    %48 = vector.extract_strided_slice %27 {offsets = [0, 17], sizes = [16, 256], strides = [1, 1]} : vector<16x290xf32> to vector<16x256xf32>
    %49 = arith.truncf %48 : vector<16x256xf32> to vector<16x256xbf16>
    %c64 = arith.constant 64 : index
    %c0_21 = arith.constant 0 : index
    %50 = vector.load %arg9[%c64, %c0_21] : memref<144x256xbf16, #tpu.memory_space<vmem>>, vector<16x256xbf16>
    tpu.vector_store %arg9[%c64, %c0_21], %49 {strides = array<i32>} : memref<144x256xbf16, #tpu.memory_space<vmem>>, vector<16x256xbf16>,
    %51 = vector.extract_strided_slice %27 {offsets = [0, 18], sizes = [16, 256], strides = [1, 1]} : vector<16x290xf32> to vector<16x256xf32>
    %52 = vector.broadcast %29 : vector<1x256xf32> to vector<16x256xf32>
    %53 = arith.mulf %51, %52 : vector<16x256xf32>
    %54 = arith.truncf %53 : vector<16x256xf32> to vector<16x256xbf16>
    %c80 = arith.constant 80 : index
    %c0_22 = arith.constant 0 : index
    %55 = vector.load %arg9[%c80, %c0_22] : memref<144x256xbf16, #tpu.memory_space<vmem>>, vector<16x256xbf16>
    tpu.vector_store %arg9[%c80, %c0_22], %54 {strides = array<i32>} : memref<144x256xbf16, #tpu.memory_space<vmem>>, vector<16x256xbf16>,
    %56 = vector.extract_strided_slice %27 {offsets = [0, 32], sizes = [16, 256], strides = [1, 1]} : vector<16x290xf32> to vector<16x256xf32>
    %57 = vector.broadcast %28 : vector<1x256xf32> to vector<16x256xf32>
    %58 = arith.mulf %56, %57 : vector<16x256xf32>
    %59 = arith.truncf %58 : vector<16x256xf32> to vector<16x256xbf16>
    %c96 = arith.constant 96 : index
    %c0_23 = arith.constant 0 : index
    %60 = vector.load %arg9[%c96, %c0_23] : memref<144x256xbf16, #tpu.memory_space<vmem>>, vector<16x256xbf16>
    tpu.vector_store %arg9[%c96, %c0_23], %59 {strides = array<i32>} : memref<144x256xbf16, #tpu.memory_space<vmem>>, vector<16x256xbf16>,
    %61 = vector.extract_strided_slice %27 {offsets = [0, 33], sizes = [16, 256], strides = [1, 1]} : vector<16x290xf32> to vector<16x256xf32>
    %62 = arith.truncf %61 : vector<16x256xf32> to vector<16x256xbf16>
    %c112 = arith.constant 112 : index
    %c0_24 = arith.constant 0 : index
    %63 = vector.load %arg9[%c112, %c0_24] : memref<144x256xbf16, #tpu.memory_space<vmem>>, vector<16x256xbf16>
    tpu.vector_store %arg9[%c112, %c0_24], %62 {strides = array<i32>} : memref<144x256xbf16, #tpu.memory_space<vmem>>, vector<16x256xbf16>,
    %64 = vector.extract_strided_slice %27 {offsets = [0, 34], sizes = [16, 256], strides = [1, 1]} : vector<16x290xf32> to vector<16x256xf32>
    %65 = vector.broadcast %29 : vector<1x256xf32> to vector<16x256xf32>
    %66 = arith.mulf %64, %65 : vector<16x256xf32>
    %67 = arith.truncf %66 : vector<16x256xf32> to vector<16x256xbf16>
    %c128 = arith.constant 128 : index
    %c0_25 = arith.constant 0 : index
    %68 = vector.load %arg9[%c128, %c0_25] : memref<144x256xbf16, #tpu.memory_space<vmem>>, vector<16x256xbf16>
    tpu.vector_store %arg9[%c128, %c0_25], %67 {strides = array<i32>} : memref<144x256xbf16, #tpu.memory_space<vmem>>, vector<16x256xbf16>,
    %c0_26 = arith.constant 0 : index
    %c0_27 = arith.constant 0 : index
    %69 = vector.load %arg2[%c0_26, %c0_27] : memref<16x144xbf16, #tpu.memory_space<vmem>>, vector<16x144xbf16>
    %c0_28 = arith.constant 0 : index
    %c0_29 = arith.constant 0 : index
    %70 = vector.load %arg9[%c0_28, %c0_29] : memref<144x256xbf16, #tpu.memory_space<vmem>>, vector<144x256xbf16>
    %cst_30 = arith.constant dense<0.000000e+00> : vector<16x256xf32>
    %71 = tpu.matmul %69, %70, %cst_30 {dimension_numbers = #tpu.dot_dimension_numbers<[1], [0], [0], [1], [0, 0, 1, 1], [], []>} : vector<16x144xbf16>, vector<144x256xbf16>, vector<16x256xf32> -> vector<16x256xf32>
    %72 = arith.truncf %71 : vector<16x256xf32> to vector<16x256xbf16>
    %c0_31 = arith.constant 0 : index
    %c0_32 = arith.constant 0 : index
    %73 = vector.load %arg7[%c0_31, %c0_32] : memref<16x256xbf16, #tpu.memory_space<vmem>>, vector<16x256xbf16>
    tpu.vector_store %arg7[%c0_31, %c0_32], %72 {strides = array<i32>} : memref<16x256xbf16, #tpu.memory_space<vmem>>, vector<16x256xbf16>,
    %cst_33 = arith.constant dense<0.000000e+00> : vector<16xf32>
    %74 = vector.multi_reduction <add>, %71, %cst_33 [1] : vector<16x256xf32> to vector<16xf32>
    %75 = vector.shape_cast %74 : vector<16xf32> to vector<16x1xf32>
    %c0_34 = arith.constant 0 : index
    %c0_35 = arith.constant 0 : index
    %c0_36 = arith.constant 0 : index
    %76 = vector.load %arg8[%c0_34, %c0_35, %c0_36] : memref<1x16x2xf32, #tpu.memory_space<vmem>>, vector<1x16x1xf32>
    %77 = vector.shape_cast %76 : vector<1x16x1xf32> to vector<16x1xf32>
    %78 = vector.shape_cast %75 : vector<16x1xf32> to vector<1x16x1xf32>
    tpu.vector_store %arg8[%c0_34, %c0_35, %c0_36], %78 {strides = array<i32>} : memref<1x16x2xf32, #tpu.memory_space<vmem>>, vector<1x16x1xf32>,
    %79 = arith.mulf %71, %71 : vector<16x256xf32>
    %cst_37 = arith.constant dense<0.000000e+00> : vector<16xf32>
    %80 = vector.multi_reduction <add>, %79, %cst_37 [1] : vector<16x256xf32> to vector<16xf32>
    %81 = vector.shape_cast %80 : vector<16xf32> to vector<16x1xf32>
    %c0_38 = arith.constant 0 : index
    %c0_39 = arith.constant 0 : index
    %c1_40 = arith.constant 1 : index
    %82 = vector.load %arg8[%c0_38, %c0_39, %c1_40] : memref<1x16x2xf32, #tpu.memory_space<vmem>>, vector<1x16x1xf32>
    %83 = vector.shape_cast %82 : vector<1x16x1xf32> to vector<16x1xf32>
    %84 = vector.shape_cast %81 : vector<16x1xf32> to vector<1x16x1xf32>
    tpu.vector_store %arg8[%c0_38, %c0_39, %c1_40], %84 {strides = array<i32>} : memref<1x16x2xf32, #tpu.memory_space<vmem>>, vector<1x16x1xf32>,
    return
  }
  func.func @transform_0(%arg0: i32) -> (i32, i32) {
    %c0_i32 = arith.constant 0 : i32
    %c0_i32_0 = arith.constant 0 : i32
    return %c0_i32, %arg0 : i32, i32
  }
  func.func @transform_1(%arg0: i32) -> (i32, i32) {
    %c0_i32 = arith.constant 0 : i32
    %c0_i32_0 = arith.constant 0 : i32
    %c0_i32_1 = arith.constant 0 : i32
    return %c0_i32, %c0_i32_0 : i32, i32
  }
  func.func @transform_2(%arg0: i32) -> (i32, i32, i32) {
    %c0_i32 = arith.constant 0 : i32
    %c0_i32_0 = arith.constant 0 : i32
    %c0_i32_1 = arith.constant 0 : i32
    %c0_i32_2 = arith.constant 0 : i32
    return %c0_i32, %c0_i32_0, %c0_i32_1 : i32, i32, i32
  }
  func.func @transform_3(%arg0: i32) -> (i32, i32) {
    %c0_i32 = arith.constant 0 : i32
    %c0_i32_0 = arith.constant 0 : i32
    %c0_i32_1 = arith.constant 0 : i32
    return %c0_i32, %c0_i32_0 : i32, i32
  }
  func.func @transform_4(%arg0: i32) -> (i32, i32) {
    %c0_i32 = arith.constant 0 : i32
    %c0_i32_0 = arith.constant 0 : i32
    %c0_i32_1 = arith.constant 0 : i32
    return %c0_i32, %c0_i32_0 : i32, i32
  }
  func.func @transform_5(%arg0: i32) -> (i32, i32) {
    %c0_i32 = arith.constant 0 : i32
    %c0_i32_0 = arith.constant 0 : i32
    %c0_i32_1 = arith.constant 0 : i32
    return %c0_i32, %c0_i32_0 : i32, i32
  }
  func.func @transform_6(%arg0: i32) -> (i32, i32) {
    %c0_i32 = arith.constant 0 : i32
    %c0_i32_0 = arith.constant 0 : i32
    return %c0_i32, %arg0 : i32, i32
  }
  func.func @transform_7(%arg0: i32) -> (i32, i32, i32) {
    %c0_i32 = arith.constant 0 : i32
    %c0_i32_0 = arith.constant 0 : i32
    %c0_i32_1 = arith.constant 0 : i32
    return %arg0, %c0_i32, %c0_i32_0 : i32, i32, i32
  }
}

module attributes {stable_mosaic.version = 11 : i64} {
  func.func @_conv3_kernel(%arg0: i32, %arg1: memref<16x128xbf16, #tpu.memory_space<vmem>>, %arg2: memref<64x16xbf16, #tpu.memory_space<vmem>>, %arg3: memref<4x16x2xf32, #tpu.memory_space<vmem>>, %arg4: memref<16x1xf32, #tpu.memory_space<vmem>>, %arg5: memref<16x1xf32, #tpu.memory_space<vmem>>, %arg6: memref<64x128xbf16, #tpu.memory_space<vmem>>, %arg7: memref<1x64x2xf32, #tpu.memory_space<vmem>>) attributes {dimension_semantics = [#tpu.dimension_semantics<parallel>], iteration_bounds = array<i64: 8>, scalar_prefetch = 0 : i64, scratch_operands = 0 : i64, tpu.core_type = #tpu.core_type<tc>, window_params = [{transform_indices = @transform_0, window_bounds = array<i64: 16, 128>}, {pipeline_mode = #tpu.pipeline_mode<synchronous>, transform_indices = @transform_1, window_bounds = array<i64: 64, 16>}, {pipeline_mode = #tpu.pipeline_mode<synchronous>, transform_indices = @transform_2, window_bounds = array<i64: 4, 16, 2>}, {pipeline_mode = #tpu.pipeline_mode<synchronous>, transform_indices = @transform_3, window_bounds = array<i64: 16, 1>}, {pipeline_mode = #tpu.pipeline_mode<synchronous>, transform_indices = @transform_4, window_bounds = array<i64: 16, 1>}, {transform_indices = @transform_5, window_bounds = array<i64: 64, 128>}, {transform_indices = @transform_6, window_bounds = array<i64: 1, 64, 2>}]} {
    %c0 = arith.constant 0 : index
    %c0_0 = arith.constant 0 : index
    %c0_1 = arith.constant 0 : index
    %0 = vector.load %arg3[%c0, %c0_0, %c0_1] : memref<4x16x2xf32, #tpu.memory_space<vmem>>, vector<4x16x2xf32>
    %cst = arith.constant dense<0.000000e+00> : vector<16x2xf32>
    %1 = vector.multi_reduction <add>, %0, %cst [0] : vector<4x16x2xf32> to vector<16x2xf32>
    %2 = vector.extract_strided_slice %1 {offsets = [0, 0], sizes = [16, 1], strides = [1, 1]} : vector<16x2xf32> to vector<16x1xf32>
    %cst_2 = arith.constant 9.765625E-4 : f32
    %3 = vector.broadcast %cst_2 : f32 to vector<16x1xf32>
    %4 = arith.mulf %2, %3 : vector<16x1xf32>
    %5 = vector.extract_strided_slice %1 {offsets = [0, 1], sizes = [16, 1], strides = [1, 1]} : vector<16x2xf32> to vector<16x1xf32>
    %cst_3 = arith.constant 9.765625E-4 : f32
    %6 = vector.broadcast %cst_3 : f32 to vector<16x1xf32>
    %7 = arith.mulf %5, %6 : vector<16x1xf32>
    %8 = arith.mulf %4, %4 : vector<16x1xf32>
    %9 = arith.subf %7, %8 : vector<16x1xf32>
    %c0_4 = arith.constant 0 : index
    %c0_5 = arith.constant 0 : index
    %10 = vector.load %arg4[%c0_4, %c0_5] : memref<16x1xf32, #tpu.memory_space<vmem>>, vector<16x1xf32>
    %cst_6 = arith.constant 9.99999974E-6 : f32
    %11 = vector.broadcast %cst_6 : f32 to vector<16x1xf32>
    %12 = arith.addf %9, %11 : vector<16x1xf32>
    %13 = math.rsqrt %12 : vector<16x1xf32>
    %14 = arith.mulf %10, %13 : vector<16x1xf32>
    %c0_7 = arith.constant 0 : index
    %c0_8 = arith.constant 0 : index
    %15 = vector.load %arg5[%c0_7, %c0_8] : memref<16x1xf32, #tpu.memory_space<vmem>>, vector<16x1xf32>
    %16 = arith.mulf %4, %14 : vector<16x1xf32>
    %17 = arith.subf %15, %16 : vector<16x1xf32>
    %c0_9 = arith.constant 0 : index
    %c0_10 = arith.constant 0 : index
    %18 = vector.load %arg1[%c0_9, %c0_10] : memref<16x128xbf16, #tpu.memory_space<vmem>>, vector<16x128xbf16>
    %19 = arith.extf %18 : vector<16x128xbf16> to vector<16x128xf32>
    %20 = vector.broadcast %14 : vector<16x1xf32> to vector<16x128xf32>
    %21 = arith.mulf %19, %20 : vector<16x128xf32>
    %22 = vector.broadcast %17 : vector<16x1xf32> to vector<16x128xf32>
    %23 = arith.addf %21, %22 : vector<16x128xf32>
    %cst_11 = arith.constant 0.000000e+00 : f32
    %24 = vector.broadcast %cst_11 : f32 to vector<16x128xf32>
    %25 = arith.maximumf %23, %24 : vector<16x128xf32>
    %c0_12 = arith.constant 0 : index
    %c0_13 = arith.constant 0 : index
    %26 = vector.load %arg2[%c0_12, %c0_13] : memref<64x16xbf16, #tpu.memory_space<vmem>>, vector<64x16xbf16>
    %27 = arith.truncf %25 : vector<16x128xf32> to vector<16x128xbf16>
    %cst_14 = arith.constant dense<0.000000e+00> : vector<64x128xf32>
    %28 = tpu.matmul %26, %27, %cst_14 {dimension_numbers = #tpu.dot_dimension_numbers<[1], [0], [0], [1], [0, 0, 1, 1], [], []>} : vector<64x16xbf16>, vector<16x128xbf16>, vector<64x128xf32> -> vector<64x128xf32>
    %29 = arith.truncf %28 : vector<64x128xf32> to vector<64x128xbf16>
    %c0_15 = arith.constant 0 : index
    %c0_16 = arith.constant 0 : index
    %30 = vector.load %arg6[%c0_15, %c0_16] : memref<64x128xbf16, #tpu.memory_space<vmem>>, vector<64x128xbf16>
    tpu.vector_store %arg6[%c0_15, %c0_16], %29 {strides = array<i32>} : memref<64x128xbf16, #tpu.memory_space<vmem>>, vector<64x128xbf16>,
    %cst_17 = arith.constant dense<0.000000e+00> : vector<64xf32>
    %31 = vector.multi_reduction <add>, %28, %cst_17 [1] : vector<64x128xf32> to vector<64xf32>
    %32 = vector.shape_cast %31 : vector<64xf32> to vector<64x1xf32>
    %c0_18 = arith.constant 0 : index
    %c0_19 = arith.constant 0 : index
    %c0_20 = arith.constant 0 : index
    %33 = vector.load %arg7[%c0_18, %c0_19, %c0_20] : memref<1x64x2xf32, #tpu.memory_space<vmem>>, vector<1x64x1xf32>
    %34 = vector.shape_cast %33 : vector<1x64x1xf32> to vector<64x1xf32>
    %35 = vector.shape_cast %32 : vector<64x1xf32> to vector<1x64x1xf32>
    tpu.vector_store %arg7[%c0_18, %c0_19, %c0_20], %35 {strides = array<i32>} : memref<1x64x2xf32, #tpu.memory_space<vmem>>, vector<1x64x1xf32>,
    %36 = arith.mulf %28, %28 : vector<64x128xf32>
    %cst_21 = arith.constant dense<0.000000e+00> : vector<64xf32>
    %37 = vector.multi_reduction <add>, %36, %cst_21 [1] : vector<64x128xf32> to vector<64xf32>
    %38 = vector.shape_cast %37 : vector<64xf32> to vector<64x1xf32>
    %c0_22 = arith.constant 0 : index
    %c0_23 = arith.constant 0 : index
    %c1 = arith.constant 1 : index
    %39 = vector.load %arg7[%c0_22, %c0_23, %c1] : memref<1x64x2xf32, #tpu.memory_space<vmem>>, vector<1x64x1xf32>
    %40 = vector.shape_cast %39 : vector<1x64x1xf32> to vector<64x1xf32>
    %41 = vector.shape_cast %38 : vector<64x1xf32> to vector<1x64x1xf32>
    tpu.vector_store %arg7[%c0_22, %c0_23, %c1], %41 {strides = array<i32>} : memref<1x64x2xf32, #tpu.memory_space<vmem>>, vector<1x64x1xf32>,
    return
  }
  func.func @transform_0(%arg0: i32) -> (i32, i32) {
    %c0_i32 = arith.constant 0 : i32
    %c0_i32_0 = arith.constant 0 : i32
    return %c0_i32, %arg0 : i32, i32
  }
  func.func @transform_1(%arg0: i32) -> (i32, i32) {
    %c0_i32 = arith.constant 0 : i32
    %c0_i32_0 = arith.constant 0 : i32
    %c0_i32_1 = arith.constant 0 : i32
    return %c0_i32, %c0_i32_0 : i32, i32
  }
  func.func @transform_2(%arg0: i32) -> (i32, i32, i32) {
    %c0_i32 = arith.constant 0 : i32
    %c0_i32_0 = arith.constant 0 : i32
    %c0_i32_1 = arith.constant 0 : i32
    %c0_i32_2 = arith.constant 0 : i32
    return %c0_i32, %c0_i32_0, %c0_i32_1 : i32, i32, i32
  }
  func.func @transform_3(%arg0: i32) -> (i32, i32) {
    %c0_i32 = arith.constant 0 : i32
    %c0_i32_0 = arith.constant 0 : i32
    %c0_i32_1 = arith.constant 0 : i32
    return %c0_i32, %c0_i32_0 : i32, i32
  }
  func.func @transform_4(%arg0: i32) -> (i32, i32) {
    %c0_i32 = arith.constant 0 : i32
    %c0_i32_0 = arith.constant 0 : i32
    %c0_i32_1 = arith.constant 0 : i32
    return %c0_i32, %c0_i32_0 : i32, i32
  }
  func.func @transform_5(%arg0: i32) -> (i32, i32) {
    %c0_i32 = arith.constant 0 : i32
    %c0_i32_0 = arith.constant 0 : i32
    return %c0_i32, %arg0 : i32, i32
  }
  func.func @transform_6(%arg0: i32) -> (i32, i32, i32) {
    %c0_i32 = arith.constant 0 : i32
    %c0_i32_0 = arith.constant 0 : i32
    %c0_i32_1 = arith.constant 0 : i32
    return %arg0, %c0_i32, %c0_i32_0 : i32, i32, i32
  }
}

module attributes {stable_mosaic.version = 11 : i64} {
  func.func @_residual_kernel(%arg0: i32, %arg1: memref<64x128xbf16, #tpu.memory_space<vmem>>, %arg2: memref<64x128xf32, #tpu.memory_space<vmem>>, %arg3: memref<8x64x2xf32, #tpu.memory_space<vmem>>, %arg4: memref<64x1xf32, #tpu.memory_space<vmem>>, %arg5: memref<64x1xf32, #tpu.memory_space<vmem>>, %arg6: memref<64x128xf32, #tpu.memory_space<vmem>>) attributes {dimension_semantics = [#tpu.dimension_semantics<parallel>], iteration_bounds = array<i64: 8>, scalar_prefetch = 0 : i64, scratch_operands = 0 : i64, tpu.core_type = #tpu.core_type<tc>, window_params = [{transform_indices = @transform_0, window_bounds = array<i64: 64, 128>}, {transform_indices = @transform_1, window_bounds = array<i64: 64, 128>}, {pipeline_mode = #tpu.pipeline_mode<synchronous>, transform_indices = @transform_2, window_bounds = array<i64: 8, 64, 2>}, {pipeline_mode = #tpu.pipeline_mode<synchronous>, transform_indices = @transform_3, window_bounds = array<i64: 64, 1>}, {pipeline_mode = #tpu.pipeline_mode<synchronous>, transform_indices = @transform_4, window_bounds = array<i64: 64, 1>}, {transform_indices = @transform_5, window_bounds = array<i64: 64, 128>}]} {
    %c0 = arith.constant 0 : index
    %c0_0 = arith.constant 0 : index
    %c0_1 = arith.constant 0 : index
    %0 = vector.load %arg3[%c0, %c0_0, %c0_1] : memref<8x64x2xf32, #tpu.memory_space<vmem>>, vector<8x64x2xf32>
    %cst = arith.constant dense<0.000000e+00> : vector<64x2xf32>
    %1 = vector.multi_reduction <add>, %0, %cst [0] : vector<8x64x2xf32> to vector<64x2xf32>
    %2 = vector.extract_strided_slice %1 {offsets = [0, 0], sizes = [64, 1], strides = [1, 1]} : vector<64x2xf32> to vector<64x1xf32>
    %cst_2 = arith.constant 9.765625E-4 : f32
    %3 = vector.broadcast %cst_2 : f32 to vector<64x1xf32>
    %4 = arith.mulf %2, %3 : vector<64x1xf32>
    %5 = vector.extract_strided_slice %1 {offsets = [0, 1], sizes = [64, 1], strides = [1, 1]} : vector<64x2xf32> to vector<64x1xf32>
    %cst_3 = arith.constant 9.765625E-4 : f32
    %6 = vector.broadcast %cst_3 : f32 to vector<64x1xf32>
    %7 = arith.mulf %5, %6 : vector<64x1xf32>
    %8 = arith.mulf %4, %4 : vector<64x1xf32>
    %9 = arith.subf %7, %8 : vector<64x1xf32>
    %c0_4 = arith.constant 0 : index
    %c0_5 = arith.constant 0 : index
    %10 = vector.load %arg4[%c0_4, %c0_5] : memref<64x1xf32, #tpu.memory_space<vmem>>, vector<64x1xf32>
    %cst_6 = arith.constant 9.99999974E-6 : f32
    %11 = vector.broadcast %cst_6 : f32 to vector<64x1xf32>
    %12 = arith.addf %9, %11 : vector<64x1xf32>
    %13 = math.rsqrt %12 : vector<64x1xf32>
    %14 = arith.mulf %10, %13 : vector<64x1xf32>
    %c0_7 = arith.constant 0 : index
    %c0_8 = arith.constant 0 : index
    %15 = vector.load %arg5[%c0_7, %c0_8] : memref<64x1xf32, #tpu.memory_space<vmem>>, vector<64x1xf32>
    %16 = arith.mulf %4, %14 : vector<64x1xf32>
    %17 = arith.subf %15, %16 : vector<64x1xf32>
    %c0_9 = arith.constant 0 : index
    %c0_10 = arith.constant 0 : index
    %18 = vector.load %arg1[%c0_9, %c0_10] : memref<64x128xbf16, #tpu.memory_space<vmem>>, vector<64x128xbf16>
    %19 = arith.extf %18 : vector<64x128xbf16> to vector<64x128xf32>
    %20 = vector.broadcast %14 : vector<64x1xf32> to vector<64x128xf32>
    %21 = arith.mulf %19, %20 : vector<64x128xf32>
    %22 = vector.broadcast %17 : vector<64x1xf32> to vector<64x128xf32>
    %23 = arith.addf %21, %22 : vector<64x128xf32>
    %c0_11 = arith.constant 0 : index
    %c0_12 = arith.constant 0 : index
    %24 = vector.load %arg2[%c0_11, %c0_12] : memref<64x128xf32, #tpu.memory_space<vmem>>, vector<64x128xf32>
    %25 = arith.addf %23, %24 : vector<64x128xf32>
    %cst_13 = arith.constant 0.000000e+00 : f32
    %26 = vector.broadcast %cst_13 : f32 to vector<64x128xf32>
    %27 = arith.maximumf %25, %26 : vector<64x128xf32>
    %c0_14 = arith.constant 0 : index
    %c0_15 = arith.constant 0 : index
    %28 = vector.load %arg6[%c0_14, %c0_15] : memref<64x128xf32, #tpu.memory_space<vmem>>, vector<64x128xf32>
    tpu.vector_store %arg6[%c0_14, %c0_15], %27 {strides = array<i32>} : memref<64x128xf32, #tpu.memory_space<vmem>>, vector<64x128xf32>,
    return
  }
  func.func @transform_0(%arg0: i32) -> (i32, i32) {
    %c0_i32 = arith.constant 0 : i32
    %c0_i32_0 = arith.constant 0 : i32
    return %c0_i32, %arg0 : i32, i32
  }
  func.func @transform_1(%arg0: i32) -> (i32, i32) {
    %c0_i32 = arith.constant 0 : i32
    %c0_i32_0 = arith.constant 0 : i32
    return %c0_i32, %arg0 : i32, i32
  }
  func.func @transform_2(%arg0: i32) -> (i32, i32, i32) {
    %c0_i32 = arith.constant 0 : i32
    %c0_i32_0 = arith.constant 0 : i32
    %c0_i32_1 = arith.constant 0 : i32
    %c0_i32_2 = arith.constant 0 : i32
    return %c0_i32, %c0_i32_0, %c0_i32_1 : i32, i32, i32
  }
  func.func @transform_3(%arg0: i32) -> (i32, i32) {
    %c0_i32 = arith.constant 0 : i32
    %c0_i32_0 = arith.constant 0 : i32
    %c0_i32_1 = arith.constant 0 : i32
    return %c0_i32, %c0_i32_0 : i32, i32
  }
  func.func @transform_4(%arg0: i32) -> (i32, i32) {
    %c0_i32 = arith.constant 0 : i32
    %c0_i32_0 = arith.constant 0 : i32
    %c0_i32_1 = arith.constant 0 : i32
    return %c0_i32, %c0_i32_0 : i32, i32
  }
  func.func @transform_5(%arg0: i32) -> (i32, i32) {
    %c0_i32 = arith.constant 0 : i32
    %c0_i32_0 = arith.constant 0 : i32
    return %c0_i32, %arg0 : i32, i32
  }
}

</mosaic_0001>

<bundles_post_ra>
// kernel: bottleneck_forward.4
= control target key start
LH: loop header
LB: loop body
LE: loop exit
PB: predicated region body
PF: predicated region fallthrough
CT: control target
= control target key end

     0   :  { %s589_s12 = smov 0   ;;  %s591_s13 = smov 0   ;;  %s657_s0 = inlined_call_operand.vmem [shape: f32[64,1024], index: 0, kind: input, shape index: {}]   ;;  %s658_s1 = inlined_call_operand.vmem [shape: bf16[16,64], index: 1, kind: input, shape index: {}]   ;;  %s659_s2 = inlined_call_operand.vmem [shape: bf16[16,1024], index: 2, kind: output, shape index: {0}]   ;;  %s660_s3 = inlined_call_operand.vmem [shape: f32[8,16,2], index: 3, kind: output, shape index: {1}]  }
   0x1   :  { %s593_s14 = smov 0  }
   0x2 LB: > { %s605_s15 = sadd.s32 4294967295, %s565_s14   ;;  %s608_s16 = sadd.s32 1, %s565_s14   ;;  %s565_s14 = sphi %s593_s14, %s664_s14   ;;  %s561_s13 = sphi %s591_s13, %s663_s13   ;;  %s557_s12 = sphi %s589_s12, %s662_s12  }
   0x3   : > { %s18_s17 = ssub.s32 %s565_s14, %s608_s16  ;;  %s21_s18 = sadd.s32 1, %s561_s13 }
   0x4   : > { %p19_p0 = scmp.eq.s32.totalorder %s18_s17, 0  ;;  %p28_p1 = scmp.ne.s32.totalorder %s561_s13, %s557_s12 }
   0x5   : > { %p29_p2 = scmp.eq.s32.totalorder %s565_s14, 0  ;;  %p79_p3 = scmp.eq.s32.totalorder %s605_s15, 7 }
   0x6   : > { %s618_s19 = scalar_select %p19_p0, %s561_s13, %s21_s18  }
   0x7   : > { %p30_p4 = por %p29_p2, %p28_p1  ;;  %p620_p5 = por %p79_p3, %p28_p1 }
   0x8   : > { %p475_p6 = scmp.ge.s32.totalorder %s565_s14, 8 }
   0xa   : > { %130 = sbr.rel (%p475_p6) target bundleno = 29 (0x1d), region = 20 }
  0x11   : > { %133 = sbr.rel (!%p30_p4) target bundleno = 29 (0x1d), region = 24  ;;  %s135_s21 = sand.u32 (%p30_p4), 1, %s561_s13  }
  0x12   : > { %s477_s22 = sshll.u32 (%p30_p4), %s565_s14, 3  ;;  %s476_s23 = sshll.u32 (%p30_p4), %s135_s21, 6 }
  0x13   : > { %s139_s26 = scalar_lea.vmem (%p30_p4), %s657_s0, %s477_s22  ;;  %s137_s27 = scalar_lea.vmem (%p30_p4), [#allocation2], %s476_s23 }
  0x14   : > { %v181_v0 = vld [vmem:[%s139_s26] sm:$0xff] (%p30_p4) }
  0x15   : > { %v183_v1 = vld [vmem:[%s139_s26 + $0x40] sm:$0xff] (%p30_p4)  ;;  %182 = vst [vmem:[%s137_s27] sm:$0xff] (%p30_p4), %v181_v0 }
  0x16   : > { %v185_v2 = vld [vmem:[%s139_s26 + $0x80] sm:$0xff] (%p30_p4)  ;;  %184 = vst [vmem:[%s137_s27 + $0x8] sm:$0xff] (%p30_p4), %v183_v1 }
  0x17   : > { %186 = vst [vmem:[%s137_s27 + $0x10] sm:$0xff] (%p30_p4), %v185_v2  ;;  %v187_v3 = vld [vmem:[%s139_s26 + $0xc0] sm:$0xff] (%p30_p4) }
  0x18   : > { %v189_v4 = vld [vmem:[%s139_s26 + $0x100] sm:$0xff]  ;;  %188 = vst [vmem:[%s137_s27 + $0x18] sm:$0xff] %v187_v3 }
  0x19   : > { %v191_v5 = vld [vmem:[%s139_s26 + $0x140] sm:$0xff]  ;;  %190 = vst [vmem:[%s137_s27 + $0x20] sm:$0xff] %v189_v4 }
  0x1a   : > { %192 = vst [vmem:[%s137_s27 + $0x28] sm:$0xff] %v191_v5  ;;  %v193_v6 = vld [vmem:[%s139_s26 + $0x180] sm:$0xff] }
  0x1b   : > { %v195_v7 = vld [vmem:[%s139_s26 + $0x1c0] sm:$0xff]  ;;  %194 = vst [vmem:[%s137_s27 + $0x30] sm:$0xff] %v193_v6 }
  0x1c   : > { %196 = vst [vmem:[%s137_s27 + $0x38] sm:$0xff] %v195_v7 }
  0x1d PF: > { %p478_p7 = scmp.ge.s32.totalorder %s565_s14, 1  ;;  %p201_p8 = scmp.lt.s32.totalorder %s565_s14, 9 }
  0x1f   : > { %p202_p9 = pnand %p478_p7, %p201_p8 }
  0x20   : > { %s208_s28 = sand.u32 (!%p202_p9), 1, %s557_s12   ;;  %v567_v8 = vmov (!%p202_p9), 0.0   ;;  %vm568_vm0 = vmmov (!%p202_p9), 0   ;;  %v542_v21 = vld [vmem:[%s658_s1] sm:$0xff] (!%p202_p9)   ;;  %vm260_vm1 = vcmask (!%p202_p9), 523264   ;;  %p235_p10 = scmp.lt.s32.totalorder (!%p202_p9), %s605_s15, 7 }
  0x21   : > { %205 = sbr.rel (%p202_p9) target bundleno = 414 (0x19e), region = 62  ;;  %504 = vmatprep.subr.bf16.mxu0 (!%p202_p9), %v567_v8  ;;  %s479_s29 = sshll.u32 (!%p202_p9), %s208_s28, 6  ;;  %512 = vmatprep.mubr.msk.bf16.mxu0 (!%p202_p9), %vm568_vm0, %v567_v8  ;;  %vm319_vm2 = vcmask (!%p202_p9), 7168   ;;  %vm328_vm3 = vcmask (!%p202_p9), 15368  }
  0x22   : > { %s210_s30 = scalar_lea.vmem (!%p202_p9), [#allocation2], %s479_s29  ;;  %s480_s6 = sshll.u32 (!%p202_p9), %s208_s28, 3 }
  0x23   : > { %v241_v9 = vld [vmem:[%s210_s30] sm:$0xff] (!%p202_p9)  ;;  %v242_v10 = vld [vmem:[%s210_s30 + $0x8] sm:$0xff] (!%p202_p9)  ;;  %v243_v11 = vld [vmem:[%s210_s30 + $0x10] sm:$0xff] (!%p202_p9)  ;;  %s227_s7 = scalar_lea.vmem (!%p202_p9), [#allocation3], %s480_s6 }
  0x24   : > { %v249_v12 = vpack.c.bf16 (!%p202_p9), %v242_v10, %v241_v9  ;;  %v244_v13 = vld [vmem:[%s210_s30 + $0x18] sm:$0xff] (!%p202_p9)  ;;  %v245_v15 = vld [vmem:[%s210_s30 + $0x20] sm:$0xff] (!%p202_p9)  ;;  %v246_v16 = vld [vmem:[%s210_s30 + $0x28] sm:$0xff] (!%p202_p9) }
  0x25   : > { %v250_v14 = vpack.c.bf16 (!%p202_p9), %v244_v13, %v243_v11  ;;  %v251_v17 = vpack.c.bf16 (!%p202_p9), %v246_v16, %v245_v15  ;;  %v247_v18 = vld [vmem:[%s210_s30 + $0x30] sm:$0xff] (!%p202_p9)  ;;  %v248_v19 = vld [vmem:[%s210_s30 + $0x38] sm:$0xff] (!%p202_p9) }
  0x26   : > { %505 = vmatpush3.bf16.msra.mxu0 (!%p202_p9), %v249_v12  ;;  %v252_v20 = vpack.c.bf16 (!%p202_p9), %v248_v19, %v247_v18 }
  0x27   : > { %506 = vmatprep.subr.bf16.mxu0 (!%p202_p9), %v567_v8 }
  0x28   : > { %s236_s8 = scalar_select %p235_p10, %s605_s15, 7 }
  0x29   : > { %s488_s14 = sshll.u32 (%p620_p5), %s605_s15, 2 }
  0x2a   : > { %507 = vmatpush3.bf16.msra.mxu0 %v250_v14  ;;  %s491_s9 = sshll.u32 %s236_s8, 4  ;;  %s344_s21 = scalar_lea.vmem (%p620_p5), %s659_s2, %s488_s14 }
  0x2b   : > { %508 = vmatprep.subr.bf16.mxu0 %v567_v8  ;;  %s239_s12 = scalar_lea.vmem %s660_s3, %s491_s9 }
  0x2e   : > { %509 = vmatpush3.bf16.msra.mxu0 %v251_v17 }
  0x2f   : > { %510 = vmatprep.subr.bf16.mxu0 %v567_v8 }
  0x32   : > { %511 = vmatpush3.bf16.msra.mxu0 %v252_v20 }
  0x35   : > { %513 = vmatmul.mubr.msk.bf16.vlgmr.msra.gmra.mrb[0].mxu0 %vm260_vm1, %v542_v21 }
 0x108   : > { %v298_v22 = vpop.f32.mrb[0].mxu0 }
 0x109   : > { %315 = vadd.xlane.f32.xlu0 %v298_v22  ;;  %v514_v23 = vpop.f32.mrb[1].mxu0  ;;  %v322_v24 = vmul.f32 %v298_v22, %v298_v22 }
 0x10a   : > { %v301_v25 = vpop.f32.mrb[2].mxu0 }
 0x10b   : > { %v497_v26 = vpack.c.bf16 %v301_v25, %v298_v22  ;;  %324 = vadd.xlane.f32.xlu1 %v322_v24  ;;  %v515_v27 = vpop.f32.mrb[3].mxu0  ;;  %v323_v28 = vmul.f32 %v301_v25, %v301_v25 }
 0x10d   : > { %498 = vst [vmem:[%s227_s7] sm:$0xff] %v497_v26   ;;  %317 = vadd.xlane.f32.xlu0 %v301_v25 }
 0x10f   : > { %326 = vadd.xlane.f32.xlu1 %v323_v28 }
 0x114   : > { %v360_v33 = vld [vmem:[%s227_s7] sm:$0xf] (%p620_p5)  ;;  %v362_v34 = vld [vmem:[%s227_s7 + $0x4] sm:$0xf] (%p620_p5) }
 0x115   : > { %361 = vst [vmem:[%s344_s21] sm:$0xf] (%p620_p5), %v360_v33  ;;  %363 = vst [vmem:[%s344_s21 + $0x20] sm:$0xf] (%p620_p5), %v362_v34 }
 0x196   : > { %v316_v29 = vpop.xlane.xlu0 %315 }
 0x197   : > { %320 = vst.msk [vmem:[%s239_s12] sm:$0xff] %vm319_vm2, %v316_v29  ;;  %342 = sbr.rel (!%p620_p5) target bundleno = 414 (0x19e), region = 70 }
 0x198   : > { %v325_v30 = vpop.xlane.xlu1 %324 }
 0x199   : > { %329 = vst.msk [vmem:[%s239_s12] sm:$0xff] %vm328_vm3, %v325_v30 }
 0x19a   : > { %v318_v31 = vpop.xlane.xlu0 %317 }
 0x19b   : > { %321 = vst.msk [vmem:[%s239_s12 + $0x8] sm:$0xff] %vm319_vm2, %v318_v31 }
 0x19c   : > { %v327_v32 = vpop.xlane.xlu1 %326 }
 0x19d   : > { %330 = vst.msk [vmem:[%s239_s12 + $0x8] sm:$0xff] %vm328_vm3, %v327_v32 }
 0x19e PF: > { %p11_p11 = scmp.ge.s32.totalorder %s608_s16, 10   ;;  %s662_s12 = smov %s561_s13 }
 0x19f   : > { %s663_s13 = smov %s618_s19  ;;  %s664_s14 = smov %s608_s16 }
 0x1a0   :  { %13 = sbr.rel (!%p11_p11) target bundleno = 2 (0x2), region = 154 }

// kernel: bottleneck_forward.6
= control target key start
LH: loop header
LB: loop body
LE: loop exit
PB: predicated region body
PF: predicated region fallthrough
CT: control target
= control target key end

     0   :  { %s947_s21 = smov 0   ;;  %s949_s22 = smov 0   ;;  %s1102_s0 = inlined_call_operand.vmem [shape: bf16[16,1024], index: 0, kind: input, shape index: {}]   ;;  %s1103_s1 = inlined_call_operand.vmem [shape: bf16[64,16], index: 1, kind: input, shape index: {}]   ;;  %s1104_s2 = inlined_call_operand.vmem [shape: f32[4,16,2], index: 2, kind: input, shape index: {}]   ;;  %s1105_s3 = inlined_call_operand.vmem [shape: f32[16,1], index: 3, kind: input, shape index: {}]   ;;  %s1106_s4 = inlined_call_operand.vmem [shape: f32[16,1], index: 4, kind: input, shape index: {}]   ;;  %s1107_s5 = inlined_call_operand.vmem [shape: bf16[64,1024], index: 5, kind: output, shape index: {0}]   ;;  %s1108_s6 = inlined_call_operand.vmem [shape: f32[8,64,2], index: 6, kind: output, shape index: {1}]  }
   0x1   :  { %s951_s23 = smov 0  }
   0x2 LB: > { %s960_s24 = sadd.s32 4294967295, %s907_s23   ;;  %s962_s25 = sadd.s32 1, %s907_s23   ;;  %s907_s23 = sphi %s951_s23, %s1112_s23   ;;  %s903_s22 = sphi %s949_s22, %s1111_s22   ;;  %s899_s21 = sphi %s947_s21, %s1110_s21  }
   0x3   : > { %s21_s26 = ssub.s32 %s907_s23, %s962_s25  ;;  %s24_s27 = sadd.s32 1, %s903_s22 }
   0x4   : > { %p22_p0 = scmp.eq.s32.totalorder %s21_s26, 0  ;;  %p31_p1 = scmp.ne.s32.totalorder %s903_s22, %s899_s21 }
   0x5   : > { %p32_p2 = scmp.eq.s32.totalorder %s907_s23, 0  ;;  %p145_p3 = scmp.eq.s32.totalorder %s960_s24, 7 }
   0x6   : > { %s970_s28 = scalar_select %p22_p0, %s903_s22, %s24_s27  }
   0x7   : > { %p33_p4 = por %p32_p2, %p31_p1  ;;  %p972_p5 = por %p145_p3, %p31_p1 }
   0x8   : > { %p767_p6 = scmp.ge.s32.totalorder %s907_s23, 8 }
   0xa   : > { %205 = sbr.rel (%p767_p6) target bundleno = 24 (0x18), region = 32 }
  0x11   : > { %208 = sbr.rel (!%p33_p4) target bundleno = 24 (0x18), region = 36  ;;  %s210_s30 = sand.u32 (%p33_p4), 1, %s903_s22  }
  0x12   : > { %s769_s7 = sshll.u32 (%p33_p4), %s907_s23, 2  ;;  %s768_s8 = sshll.u32 (%p33_p4), %s210_s30, 3 }
  0x13   : > { %s214_s11 = scalar_lea.vmem (%p33_p4), %s1102_s0, %s769_s7  ;;  %s212_s12 = scalar_lea.vmem (%p33_p4), [#allocation2], %s768_s8 }
  0x14   : > { %v230_v0 = vld [vmem:[%s214_s11] sm:$0xf] (%p33_p4) }
  0x15   : > { %v232_v1 = vld [vmem:[%s214_s11 + $0x20] sm:$0xf] (%p33_p4)  ;;  %231 = vst [vmem:[%s212_s12] sm:$0xf] (%p33_p4), %v230_v0 }
  0x16   : > { %233 = vst [vmem:[%s212_s12 + $0x4] sm:$0xf] (%p33_p4), %v232_v1 }
  0x18 PF: > { %p770_p7 = scmp.ge.s32.totalorder %s907_s23, 1  ;;  %p259_p8 = scmp.lt.s32.totalorder %s907_s23, 9 }
  0x1a   : > { %p260_p9 = pnand %p770_p7, %p259_p8 }
  0x1b   : > { %v305_v2 = vld [vmem:[%s1104_s2] sm:$0xff] (!%p260_p9)  ;;  %v307_v3 = vld [vmem:[%s1104_s2 + $0x10] sm:$0xff] (!%p260_p9)  ;;  %vm313_vm0 = vcmask (!%p260_p9), 15360   ;;  %v306_v9 = vld [vmem:[%s1104_s2 + $0x8] sm:$0xff] (!%p260_p9)  ;;  %s909_s11 = smov (!%p260_p9), 1   ;;  %v910_v32 = vmov (!%p260_p9), 0  }
  0x1c   : > { %263 = sbr.rel (%p260_p9) target bundleno = 816 (0x330), region = 77  ;;  %v309_v4 = vld [vmem:[%s1104_s2 + $0x20] sm:$0xff] (!%p260_p9)  ;;  %v311_v5 = vld [vmem:[%s1104_s2 + $0x30] sm:$0xff] (!%p260_p9)  ;;  %v314_v6 = vsel (!%p260_p9), %vm313_vm0, %v305_v2, 0.0  ;;  %v315_v7 = vsel (!%p260_p9), %vm313_vm0, %v307_v3, 0.0  ;;  %v308_v10 = vld [vmem:[%s1104_s2 + $0x18] sm:$0xff] (!%p260_p9)  ;;  %875 = vset.pattern.permute.xlu0 (!%p260_p9), %v910_v32  ;;  %876 = vset.pattern.permute.xlu1 (!%p260_p9), %v910_v32 }
  0x1d   : > { %v317_v8 = vsel (!%p260_p9), %vm313_vm0, %v309_v4, 0.0  ;;  %v316_v11 = vadd.f32 (!%p260_p9), %v315_v7, %v314_v6  ;;  %v319_v12 = vsel (!%p260_p9), %vm313_vm0, %v311_v5, 0.0  ;;  %v310_v13 = vld [vmem:[%s1104_s2 + $0x28] sm:$0xff] (!%p260_p9)  ;;  %v312_v14 = vld [vmem:[%s1104_s2 + $0x38] sm:$0xff] (!%p260_p9)  ;;  %v321_v15 = vsel (!%p260_p9), %vm313_vm0, %v306_v9, 0.0  ;;  %s911_s12 = smov (!%p260_p9), 127  }
  0x1e   : > { %v322_v16 = vsel (!%p260_p9), %vm313_vm0, %v308_v10, 0.0  ;;  %v324_v18 = vsel (!%p260_p9), %vm313_vm0, %v310_v13, 0.0  ;;  %v326_v19 = vsel (!%p260_p9), %vm313_vm0, %v312_v14, 0.0  ;;  %v342_v37 = vld [vmem:[%s1105_s3] sm:$0xff] (!%p260_p9)  ;;  %v343_v40 = vld [vmem:[%s1105_s3 + $0x8] sm:$0xff] (!%p260_p9)  ;;  %vm423_vm1 = vcmask (!%p260_p9), 130048  }
  0x1f   : > { %v323_v17 = vadd.f32 (!%p260_p9), %v322_v16, %v321_v15  ;;  %v318_v20 = vadd.f32 (!%p260_p9), %v317_v8, %v316_v11  ;;  %v358_v44 = vld [vmem:[%s1106_s4] sm:$0xff] (!%p260_p9)  ;;  %v359_v45 = vld [vmem:[%s1106_s4 + $0x8] sm:$0xff] (!%p260_p9)  ;;  %v879_v50 = vld [vmem:[%s1103_s1 + $0x10] sm:$0xff] (!%p260_p9)   ;;  %s266_s7 = sand.u32 (!%p260_p9), 1, %s899_s21   ;;  %p299_p10 = scmp.lt.s32.totalorder (!%p260_p9), %s960_s24, 7  ;;  %vm557_vm2 = vcmask (!%p260_p9), 7168  }
  0x20   : > { %v877_v49 = vld [vmem:[%s1103_s1] sm:$0xff] (!%p260_p9)   ;;  %842 = vmatprep.mubr.msk.bf16.mxu1 (!%p260_p9), %vm423_vm1, %v879_v50  ;;  %s771_s8 = sshll.u32 (!%p260_p9), %s266_s7, 3  ;;  %v878_v1 = vld [vmem:[%s1103_s1 + $0x8] sm:$0xff] (!%p260_p9)   ;;  %v880_v2 = vld [vmem:[%s1103_s1 + $0x18] sm:$0xff] (!%p260_p9)   ;;  %s772_s13 = sshll.u32 (!%p260_p9), %s266_s7, 5  ;;  %vm590_vm3 = vcmask (!%p260_p9), 15368  }
  0x21   : > { %v325_v21 = vadd.f32 (!%p260_p9), %v324_v18, %v323_v17  ;;  %v320_v22 = vadd.f32 (!%p260_p9), %v319_v12, %v318_v20  ;;  %838 = vmatprep.mubr.msk.bf16.mxu0 (!%p260_p9), %vm423_vm1, %v877_v49  ;;  %s268_s9 = scalar_lea.vmem (!%p260_p9), [#allocation2], %s771_s8  ;;  %s1033_s14 = scalar_lea.vmem (!%p260_p9), [#allocation3], %s772_s13 }
  0x22   : > { %v805_v51 = vld [vmem:[%s268_s9] sm:$0xff] (!%p260_p9)  }
  0x23   : > { %v327_v23 = vadd.f32 %v326_v19, %v325_v21  ;;  %v328_v24 = vmul.f32 0.0009765625, %v320_v22  ;;  %v806_v52 = vunpack.c.l.bf16 %v805_v51  ;;  %v807_v53 = vunpack.c.h.bf16 %v805_v51  ;;  %s300_s15 = scalar_select %p299_p10, %s960_s24, 7 }
  0x24   : > { %s792_s20 = sshll.u32 (%p972_p5), %s960_s24, 2 }
  0x25   : > { %v329_v25 = vmul.f32 0.0009765625, %v327_v23  ;;  %v330_v26 = vmul.f32 %v328_v24, %v328_v24  ;;  %s795_s16 = sshll.u32 %s300_s15, 6  ;;  %s612_s27 = scalar_lea.vmem (%p972_p5), %s1107_s5, %s792_s20 }
  0x26   : > { %s1044_s19 = scalar_lea.vmem %s1108_s6, %s795_s16 }
  0x27   : > { %334 = vrot.lane.b32.xlu0 %v330_v26, %s909_s11  ;;  %v331_v27 = vmul.f32 %v329_v25, %v329_v25 }
  0x2b   : > { %336 = vrot.lane.b32.xlu0 %v331_v27, %s909_s11 }
  0x99   : > { %v335_v28 = vpop.permute.xlu0 %334 }
  0x9a   : > { %v340_v29 = vsub.f32 %v328_v24, %v335_v28 }
  0x9c   : > { %v344_v30 = vadd.f32 1e-05, %v340_v29 }
  0x9d   : > { %v337_v31 = vpop.permute.xlu0 %336 }
  0x9e   : > { %881 = vrsqrt.f32 %v344_v30  ;;  %v341_v33 = vsub.f32 %v329_v25, %v337_v31 }
  0xa0   : > { %v345_v34 = vadd.f32 1e-05, %v341_v33 }
  0xa2   : > { %883 = vrsqrt.f32 %v345_v34 }
  0xa8   : > { %v882_v35 = vpop.eup %881 }
  0xa9   : > { %350 = vrot.lane.b32.xlu1 %v882_v35, %s911_s12 }
  0xac   : > { %v884_v36 = vpop.eup %883 }
  0xad   : > { %352 = vrot.lane.b32.xlu1 %v884_v36, %s911_s12 }
 0x11b   : > { %v351_v38 = vpop.permute.xlu1 %350 }
 0x11c   : > { %v356_v39 = vmul.f32 %v351_v38, %v342_v37 }
 0x11e   : > { %370 = vperm.xlu0 %875, %v356_v39   ;;  %v360_v42 = vmul.f32 %v356_v39, %v328_v24 }
 0x11f   : > { %v353_v41 = vpop.permute.xlu1 %352 }
 0x120   : > { %v357_v43 = vmul.f32 %v353_v41, %v343_v40  ;;  %v362_v47 = vsub.f32 %v358_v44, %v360_v42 }
 0x122   : > { %v361_v46 = vmul.f32 %v357_v43, %v329_v25  ;;  %375 = vperm.xlu1 %876, %v357_v43  }
 0x124   : > { %v363_v48 = vsub.f32 %v359_v45, %v361_v46 }
 0x126   : > { %382 = vperm.xlu1 %876, %v362_v47   ;;  %387 = vperm.xlu0 %875, %v363_v48  }
 0x19d   : > { %v371_v54 = vpop.permute.xlu0 %370 }
 0x19e   : > { %v378_v56 = vmul.f32 %v806_v52, %v371_v54 }
 0x1a1   : > { %v376_v55 = vpop.permute.xlu1 %375 }
 0x1a2   : > { %v379_v57 = vmul.f32 %v807_v53, %v376_v55 }
 0x1a5   : > { %v383_v58 = vpop.permute.xlu1 %382  ;;  %v388_v59 = vpop.permute.xlu0 %387 }
 0x1a6   : > { %v390_v60 = vadd.f32 %v383_v58, %v378_v56  ;;  %v391_v61 = vadd.f32 %v388_v59, %v379_v57 }
 0x1a8   : > { %v392_v62 = vmax.f32 %v390_v60, 0.0  ;;  %v393_v63 = vmax.f32 %v391_v61, 0.0 }
 0x1aa   : > { %v402_v0 = vpack.c.bf16 %v393_v63, %v392_v62 }
 0x1ac   : > { %836 = vmatprep.subr.bf16.mxu0 %v402_v0  ;;  %846 = vmatprep.subr.bf16.mxu1 %v402_v0 }
 0x1ad   : > { %837 = vmatpush3.bf16.msra.mxu0 %v402_v0  ;;  %847 = vmatpush3.bf16.msra.mxu1 %v402_v0 }
 0x1b0   : > { %839 = vmatmul.mubr.msk.bf16.vlgmr.msra.gmra.mrb[0].mxu0 %vm423_vm1, %v878_v1  ;;  %843 = vmatmul.mubr.msk.bf16.vlgmr.msra.gmra.mrb[0].mxu1 %vm423_vm1, %v880_v2 }
 0x283   : > { %v840_v3 = vpop.f32.mrb[0].mxu0  ;;  %v844_v4 = vpop.f32.mrb[0].mxu1 }
 0x284   : > { %545 = vadd.xlane.f32.xlu0 %v840_v3  ;;  %v470_v5 = vpop.f32.mrb[1].mxu0  ;;  %v486_v6 = vpop.f32.mrb[1].mxu1  ;;  %v568_v15 = vmul.f32 %v840_v3, %v840_v3  ;;  %v572_v21 = vmul.f32 %v844_v4, %v844_v4 }
 0x285   : > { %541 = vadd.xlane.f32.xlu1 %v470_v5  ;;  %v841_v7 = vpop.f32.mrb[2].mxu0  ;;  %v845_v8 = vpop.f32.mrb[2].mxu1  ;;  %v566_v17 = vmul.f32 %v470_v5, %v470_v5  ;;  %v570_v19 = vmul.f32 %v486_v6, %v486_v6 }
 0x286   : > { %v816_v9 = vpack.c.bf16 %v841_v7, %v840_v3  ;;  %v473_v10 = vpop.f32.mrb[3].mxu0  ;;  %v826_v11 = vpack.c.bf16 %v845_v8, %v844_v4  ;;  %v489_v12 = vpop.f32.mrb[3].mxu1  ;;  %v569_v16 = vmul.f32 %v841_v7, %v841_v7  ;;  %v573_v22 = vmul.f32 %v845_v8, %v845_v8 }
 0x287   : > { %v811_v13 = vpack.c.bf16 %v473_v10, %v470_v5  ;;  %v821_v14 = vpack.c.bf16 %v489_v12, %v486_v6  ;;  %v567_v18 = vmul.f32 %v473_v10, %v473_v10  ;;  %v571_v20 = vmul.f32 %v489_v12, %v489_v12 }
 0x288   : > { %828 = vst [vmem:[%s1033_s14 + $0x8] sm:$0xff] %v816_v9   ;;  %830 = vst [vmem:[%s1033_s14 + $0x18] sm:$0xff] %v826_v11   ;;  %553 = vadd.xlane.f32.xlu0 %v844_v4 }
 0x289   : > { %812 = vst [vmem:[%s1033_s14] sm:$0xff] %v811_v13   ;;  %829 = vst [vmem:[%s1033_s14 + $0x10] sm:$0xff] %v821_v14   ;;  %547 = vadd.xlane.f32.xlu1 %v841_v7 }
 0x28c   : > { %549 = vadd.xlane.f32.xlu0 %v486_v6 }
 0x28d   : > { %555 = vadd.xlane.f32.xlu1 %v845_v8 }
 0x28f   : > { %v632_v41 = vld [vmem:[%s1033_s14 + $0x8] sm:$0xf] (%p972_p5)  ;;  %v634_v42 = vld [vmem:[%s1033_s14 + $0xc] sm:$0xf] (%p972_p5)  ;;  %v640_v45 = vld [vmem:[%s1033_s14 + $0x18] sm:$0xf] (%p972_p5) }
 0x290   : > { %578 = vadd.xlane.f32.xlu0 %v568_v15  ;;  %v628_v39 = vld [vmem:[%s1033_s14] sm:$0xf] (%p972_p5)  ;;  %v630_v40 = vld [vmem:[%s1033_s14 + $0x4] sm:$0xf] (%p972_p5)  ;;  %v636_v43 = vld [vmem:[%s1033_s14 + $0x10] sm:$0xf] (%p972_p5) }
 0x291   : > { %551 = vadd.xlane.f32.xlu1 %v489_v12  ;;  %629 = vst [vmem:[%s612_s27] sm:$0xf] (%p972_p5), %v628_v39  ;;  %631 = vst [vmem:[%s612_s27 + $0x20] sm:$0xf] (%p972_p5), %v630_v40  ;;  %v638_v44 = vld [vmem:[%s1033_s14 + $0x14] sm:$0xf] (%p972_p5) }
 0x292   : > { %633 = vst [vmem:[%s612_s27 + $0x40] sm:$0xf] (%p972_p5), %v632_v41  ;;  %635 = vst [vmem:[%s612_s27 + $0x60] sm:$0xf] (%p972_p5), %v634_v42  ;;  %v642_v46 = vld [vmem:[%s1033_s14 + $0x1c] sm:$0xf] (%p972_p5) }
 0x293   : > { %637 = vst [vmem:[%s612_s27 + $0x80] sm:$0xf] (%p972_p5), %v636_v43  ;;  %639 = vst [vmem:[%s612_s27 + $0xa0] sm:$0xf] (%p972_p5), %v638_v44 }
 0x294   : > { %543 = vadd.xlane.f32.xlu0 %v473_v10  ;;  %641 = vst [vmem:[%s612_s27 + $0xc0] sm:$0xf] (%p972_p5), %v640_v45  ;;  %643 = vst [vmem:[%s612_s27 + $0xe0] sm:$0xf] (%p972_p5), %v642_v46 }
 0x295   : > { %580 = vadd.xlane.f32.xlu1 %v569_v16 }
 0x298   : > { %574 = vadd.xlane.f32.xlu0 %v566_v17 }
 0x299   : > { %576 = vadd.xlane.f32.xlu1 %v567_v18 }
 0x29c   : > { %582 = vadd.xlane.f32.xlu0 %v570_v19 }
 0x29d   : > { %584 = vadd.xlane.f32.xlu1 %v571_v20 }
 0x2a0   : > { %586 = vadd.xlane.f32.xlu0 %v572_v21 }
 0x2a1   : > { %588 = vadd.xlane.f32.xlu1 %v573_v22 }
 0x311   : > { %v546_v23 = vpop.xlane.xlu0 %545 }
 0x312   : > { %560 = vst.msk [vmem:[%s1044_s19 + $0x10] sm:$0xff] %vm557_vm2, %v546_v23  ;;  %v542_v24 = vpop.xlane.xlu1 %541 }
 0x313   : > { %558 = vst.msk [vmem:[%s1044_s19] sm:$0xff] %vm557_vm2, %v542_v24 }
 0x315   : > { %v554_v25 = vpop.xlane.xlu0 %553 }
 0x316   : > { %564 = vst.msk [vmem:[%s1044_s19 + $0x30] sm:$0xff] %vm557_vm2, %v554_v25  ;;  %v548_v26 = vpop.xlane.xlu1 %547 }
 0x317   : > { %561 = vst.msk [vmem:[%s1044_s19 + $0x18] sm:$0xff] %vm557_vm2, %v548_v26 }
 0x319   : > { %v550_v27 = vpop.xlane.xlu0 %549 }
 0x31a   : > { %562 = vst.msk [vmem:[%s1044_s19 + $0x20] sm:$0xff] %vm557_vm2, %v550_v27  ;;  %v556_v28 = vpop.xlane.xlu1 %555 }
 0x31b   : > { %565 = vst.msk [vmem:[%s1044_s19 + $0x38] sm:$0xff] %vm557_vm2, %v556_v28 }
 0x31d   : > { %v579_v29 = vpop.xlane.xlu0 %578 }
 0x31e   : > { %593 = vst.msk [vmem:[%s1044_s19 + $0x10] sm:$0xff] %vm590_vm3, %v579_v29  ;;  %v552_v30 = vpop.xlane.xlu1 %551 }
 0x31f   : > { %563 = vst.msk [vmem:[%s1044_s19 + $0x28] sm:$0xff] %vm557_vm2, %v552_v30 }
 0x321   : > { %v544_v31 = vpop.xlane.xlu0 %543 }
 0x322   : > { %559 = vst.msk [vmem:[%s1044_s19 + $0x8] sm:$0xff] %vm557_vm2, %v544_v31  ;;  %v581_v32 = vpop.xlane.xlu1 %580 }
 0x323   : > { %594 = vst.msk [vmem:[%s1044_s19 + $0x18] sm:$0xff] %vm590_vm3, %v581_v32 }
 0x325   : > { %v575_v33 = vpop.xlane.xlu0 %574 }
 0x326   : > { %591 = vst.msk [vmem:[%s1044_s19] sm:$0xff] %vm590_vm3, %v575_v33  ;;  %v577_v34 = vpop.xlane.xlu1 %576 }
 0x327   : > { %592 = vst.msk [vmem:[%s1044_s19 + $0x8] sm:$0xff] %vm590_vm3, %v577_v34 }
 0x329   : > { %v583_v35 = vpop.xlane.xlu0 %582  ;;  %610 = sbr.rel (!%p972_p5) target bundleno = 816 (0x330), region = 85 }
 0x32a   : > { %595 = vst.msk [vmem:[%s1044_s19 + $0x20] sm:$0xff] %vm590_vm3, %v583_v35  ;;  %v585_v36 = vpop.xlane.xlu1 %584 }
 0x32b   : > { %596 = vst.msk [vmem:[%s1044_s19 + $0x28] sm:$0xff] %vm590_vm3, %v585_v36 }
 0x32d   : > { %v587_v37 = vpop.xlane.xlu0 %586 }
 0x32e   : > { %597 = vst.msk [vmem:[%s1044_s19 + $0x30] sm:$0xff] %vm590_vm3, %v587_v37  ;;  %v589_v38 = vpop.xlane.xlu1 %588 }
 0x32f   : > { %598 = vst.msk [vmem:[%s1044_s19 + $0x38] sm:$0xff] %vm590_vm3, %v589_v38 }
 0x330 PF: > { %p14_p11 = scmp.ge.s32.totalorder %s962_s25, 10   ;;  %s1110_s21 = smov %s903_s22 }
 0x331   : > { %s1111_s22 = smov %s970_s28  ;;  %s1112_s23 = smov %s962_s25 }
 0x332   :  { %16 = sbr.rel (!%p14_p11) target bundleno = 2 (0x2), region = 169 }

// kernel: bottleneck_forward.5
= control target key start
LH: loop header
LB: loop body
LE: loop exit
PB: predicated region body
PF: predicated region fallthrough
CT: control target
= control target key end

     0   :  { %s1122_s24 = smov 0   ;;  %s1124_s25 = smov 0   ;;  %s1342_s0 = inlined_call_operand.vmem [shape: bf16[16,1024], index: 0, kind: input, shape index: {}]   ;;  %s1343_s1 = inlined_call_operand.vmem [shape: bf16[16,144], index: 1, kind: input, shape index: {}]   ;;  %s1344_s2 = inlined_call_operand.vmem [shape: f32[8,16,2], index: 2, kind: input, shape index: {}]   ;;  %s1345_s3 = inlined_call_operand.vmem [shape: f32[16,1], index: 3, kind: input, shape index: {}]   ;;  %s1346_s4 = inlined_call_operand.vmem [shape: f32[16,1], index: 4, kind: input, shape index: {}]   ;;  %s1347_s5 = inlined_call_operand.vmem [shape: f32[2,256], index: 5, kind: input, shape index: {}]   ;;  %s1348_s6 = inlined_call_operand.vmem [shape: bf16[16,1024], index: 6, kind: output, shape index: {0}]   ;;  %s1349_s7 = inlined_call_operand.vmem [shape: f32[4,16,2], index: 7, kind: output, shape index: {1}]  }
   0x1   :  { %s1126_s26 = smov 0  }
   0x2 LB: > { %s1135_s27 = sadd.s32 4294967295, %s1064_s26   ;;  %s1137_s28 = sadd.s32 1, %s1064_s26   ;;  %s1064_s26 = sphi %s1126_s26, %s1353_s26   ;;  %s1060_s25 = sphi %s1124_s25, %s1352_s25   ;;  %s1056_s24 = sphi %s1122_s24, %s1351_s24  }
   0x3   : > { %s22_s29 = ssub.s32 %s1064_s26, %s1137_s28  ;;  %s25_s30 = sadd.s32 1, %s1060_s25 }
   0x4   : > { %p23_p0 = scmp.eq.s32.totalorder %s22_s29, 0  ;;  %p32_p1 = scmp.ne.s32.totalorder %s1060_s25, %s1056_s24 }
   0x5   : > { %p33_p2 = scmp.eq.s32.totalorder %s1064_s26, 0  ;;  %p167_p3 = scmp.eq.s32.totalorder %s1135_s27, 3 }
   0x6   : > { %s1145_s8 = scalar_select %p23_p0, %s1060_s25, %s25_s30  }
   0x7   : > { %p34_p4 = por %p33_p2, %p32_p1  ;;  %p1147_p5 = por %p167_p3, %p32_p1 }
   0x8   : > { %p968_p6 = scmp.ge.s32.totalorder %s1064_s26, 4 }
   0xa   : > { %230 = sbr.rel (%p968_p6) target bundleno = 24 (0x18), region = 36 }
  0x11   : > { %233 = sbr.rel (!%p34_p4) target bundleno = 24 (0x18), region = 40  ;;  %s235_s10 = sand.u32 (%p34_p4), 1, %s1060_s25  }
  0x12   : > { %s988_s11 = sshll.u32 (%p34_p4), %s1064_s26, 3  ;;  %s969_s12 = sshll.u32 (%p34_p4), %s235_s10, 4 }
  0x13   : > { %s240_s15 = scalar_lea.vmem (%p34_p4), %s1342_s0, %s988_s11  ;;  %s237_s16 = scalar_lea.vmem (%p34_p4), [#allocation3], %s969_s12 }
  0x14   : > { %v270_v0 = vld [vmem:[%s240_s15] sm:$0xff] (%p34_p4) }
  0x15   : > { %v272_v1 = vld [vmem:[%s240_s15 + $0x20] sm:$0xff] (%p34_p4)  ;;  %271 = vst [vmem:[%s237_s16] sm:$0xff] (%p34_p4), %v270_v0 }
  0x16   : > { %273 = vst [vmem:[%s237_s16 + $0x8] sm:$0xff] (%p34_p4), %v272_v1 }
  0x18 PF: > { %p972_p7 = scmp.ge.s32.totalorder %s1064_s26, 1  ;;  %p278_p8 = scmp.lt.s32.totalorder %s1064_s26, 5 }
  0x1a   : > { %p279_p9 = pnand %p972_p7, %p278_p8 }
  0x1b   : > { %v328_v2 = vld [vmem:[%s1344_s2] sm:$0xff] (!%p279_p9)  ;;  %v330_v3 = vld [vmem:[%s1344_s2 + $0x10] sm:$0xff] (!%p279_p9)  ;;  %vm344_vm0 = vcmask (!%p279_p9), 15360   ;;  %v329_v11 = vld [vmem:[%s1344_s2 + $0x8] sm:$0xff] (!%p279_p9)  ;;  %s1066_s15 = smov (!%p279_p9), 1   ;;  %v1067_v56 = vmov (!%p279_p9), 0  }
  0x1c   : > { %282 = sbr.rel (%p279_p9) target bundleno = 1084 (0x43c), region = 78  ;;  %v332_v4 = vld [vmem:[%s1344_s2 + $0x20] sm:$0xff] (!%p279_p9)  ;;  %v334_v5 = vld [vmem:[%s1344_s2 + $0x30] sm:$0xff] (!%p279_p9)  ;;  %v345_v6 = vsel (!%p279_p9), %vm344_vm0, %v328_v2, 0.0  ;;  %v346_v7 = vsel (!%p279_p9), %vm344_vm0, %v330_v3, 0.0  ;;  %v331_v13 = vld [vmem:[%s1344_s2 + $0x18] sm:$0xff] (!%p279_p9)  ;;  %1033 = vset.pattern.permute.xlu0 (!%p279_p9), %v1067_v56  ;;  %1034 = vset.pattern.permute.xlu1 (!%p279_p9), %v1067_v56 }
  0x1d   : > { %v348_v8 = vsel (!%p279_p9), %vm344_vm0, %v332_v4, 0.0  ;;  %v336_v9 = vld [vmem:[%s1344_s2 + $0x40] sm:$0xff] (!%p279_p9)  ;;  %v347_v10 = vadd.f32 (!%p279_p9), %v346_v7, %v345_v6  ;;  %v350_v12 = vsel (!%p279_p9), %vm344_vm0, %v334_v5, 0.0  ;;  %v333_v14 = vld [vmem:[%s1344_s2 + $0x28] sm:$0xff] (!%p279_p9)  ;;  %v335_v15 = vld [vmem:[%s1344_s2 + $0x38] sm:$0xff] (!%p279_p9)  ;;  %v360_v16 = vsel (!%p279_p9), %vm344_vm0, %v329_v11, 0.0 }
  0x1e   : > { %v338_v17 = vld [vmem:[%s1344_s2 + $0x50] sm:$0xff] (!%p279_p9)  ;;  %v361_v19 = vsel (!%p279_p9), %vm344_vm0, %v331_v13, 0.0  ;;  %v363_v20 = vsel (!%p279_p9), %vm344_vm0, %v333_v14, 0.0  ;;  %v352_v21 = vsel (!%p279_p9), %vm344_vm0, %v336_v9, 0.0  ;;  %v337_v22 = vld [vmem:[%s1344_s2 + $0x48] sm:$0xff] (!%p279_p9)  ;;  %v340_v24 = vld [vmem:[%s1344_s2 + $0x60] sm:$0xff] (!%p279_p9) }
  0x1f   : > { %v349_v18 = vadd.f32 (!%p279_p9), %v348_v8, %v347_v10  ;;  %v362_v23 = vadd.f32 (!%p279_p9), %v361_v19, %v360_v16  ;;  %v365_v26 = vsel (!%p279_p9), %vm344_vm0, %v335_v15, 0.0  ;;  %v354_v27 = vsel (!%p279_p9), %vm344_vm0, %v338_v17, 0.0  ;;  %v339_v28 = vld [vmem:[%s1344_s2 + $0x58] sm:$0xff] (!%p279_p9)  ;;  %v342_v30 = vld [vmem:[%s1344_s2 + $0x70] sm:$0xff] (!%p279_p9)  ;;  %v341_v34 = vld [vmem:[%s1344_s2 + $0x68] sm:$0xff] (!%p279_p9)  ;;  %s1068_s16 = smov (!%p279_p9), 127  }
  0x20   : > { %v367_v32 = vsel (!%p279_p9), %vm344_vm0, %v337_v22, 0.0  ;;  %v356_v33 = vsel (!%p279_p9), %vm344_vm0, %v340_v24, 0.0  ;;  %v369_v37 = vsel (!%p279_p9), %vm344_vm0, %v339_v28, 0.0  ;;  %v358_v38 = vsel (!%p279_p9), %vm344_vm0, %v342_v30, 0.0  ;;  %v343_v39 = vld [vmem:[%s1344_s2 + $0x78] sm:$0xff] (!%p279_p9)  ;;  %v389_v61 = vld [vmem:[%s1345_s3] sm:$0xff] (!%p279_p9) }
  0x21   : > { %v351_v25 = vadd.f32 (!%p279_p9), %v350_v12, %v349_v18  ;;  %v364_v29 = vadd.f32 (!%p279_p9), %v363_v20, %v362_v23  ;;  %v371_v42 = vsel (!%p279_p9), %vm344_vm0, %v341_v34, 0.0  ;;  %v373_v45 = vsel (!%p279_p9), %vm344_vm0, %v343_v39, 0.0  ;;  %v390_v0 = vld [vmem:[%s1345_s3 + $0x8] sm:$0xff] (!%p279_p9)  ;;  %v405_v4 = vld [vmem:[%s1346_s4] sm:$0xff] (!%p279_p9)  ;;  %s285_s26 = sand.u32 (!%p279_p9), 1, %s1056_s24   ;;  %s1069_s24 = smov (!%p279_p9), 17  }
  0x22   : > { %v406_v5 = vld [vmem:[%s1346_s4 + $0x8] sm:$0xff] (!%p279_p9)  ;;  %s1234_s30 = sshll.u32 (!%p279_p9), %s285_s26, 4  ;;  %v478_v15 = vlaneseq (!%p279_p9)  ;;  %s1071_s17 = smov (!%p279_p9), 16   ;;  %vm461_vm1 = vcmask (!%p279_p9), 138240   ;;  %vm561_vm2 = vcmask (!%p279_p9), 130048   ;;  %vm608_vm3 = vcmask (!%p279_p9), 146432  }
  0x23   : > { %v353_v31 = vadd.f32 %v352_v21, %v351_v25  ;;  %v366_v35 = vadd.f32 %v365_v26, %v364_v29  ;;  %s287_s10 = scalar_lea.vmem [#allocation3], %s1234_s30  ;;  %s1072_s18 = smov 18   ;;  %vm642_vm4 = vcmask 261120   ;;  %vm689_vm5 = vcmask 277504  }
  0x24   : > { %v411_v9 = vld [vmem:[%s287_s10] sm:$0xff]  ;;  %v412_v10 = vld [vmem:[%s287_s10 + $0x8] sm:$0xff]  ;;  %v479_v22 = vshrl.u32 %v478_v15, 7  ;;  %s1073_s19 = smov 32   ;;  %s1074_s20 = smov 34   ;;  %vm508_vm6 = vcmask 1039360  }
  0x25   : > { %v355_v36 = vadd.f32 %v354_v27, %v353_v31  ;;  %v368_v40 = vadd.f32 %v367_v32, %v366_v35  ;;  %v413_v11 = vunpack.c.l.bf16 %v411_v9  ;;  %v414_v12 = vunpack.c.h.bf16 %v411_v9  ;;  %s1075_s21 = smov 111   ;;  %s1077_s22 = smov 126  }
  0x26   : > { %v415_v16 = vunpack.c.l.bf16 %v412_v10  ;;  %v416_v17 = vunpack.c.h.bf16 %v412_v10  ;;  %v484_v31 = vsub.s32 1, %v479_v22  ;;  %v480_v32 = vsub.s32 0, %v479_v22  ;;  %s1078_s23 = smov 112   ;;  %s1079_s29 = smov 110  }
  0x27   : > { %v357_v41 = vadd.f32 %v356_v33, %v355_v36  ;;  %v370_v43 = vadd.f32 %v369_v37, %v368_v40  ;;  %v977_v33 = vld [vmem:[%s1347_s5 + $0x1] ss:$2 sm:$0x3]  ;;  %s1080_s26 = smov 96   ;;  %s1081_s11 = smov 94   ;;  %vm550_vm7 = vcmask 1031168  }
  0x28   : > { %v523_v36 = vrot.slane %v977_v33, %v484_v31  ;;  %v519_v37 = vrot.slane %v977_v33, %v480_v32  ;;  %vm584_vm8 = vcmask 916480   ;;  %vm597_vm9 = vcmask 908288   ;;  %s312_s14 = scalar_lea.vmem [#allocation4], %s1234_s30  ;;  %p322_p10 = scmp.lt.s32.totalorder %s1135_s27, 3 }
  0x29   : > { %v359_v44 = vadd.f32 %v358_v38, %v357_v41  ;;  %v372_v46 = vadd.f32 %v371_v42, %v370_v43  ;;  %v474_v38 = vld [vmem:[%s1347_s5] ss:$2 sm:$0x3]  ;;  %vm631_vm10 = vcmask 900096   ;;  %vm665_vm11 = vcmask 785408   ;;  %s992_s30 = sshll.u32 (%p1147_p5), %s1135_s27, 3 }
  0x2a   : > { %v485_v39 = vrot.slane %v474_v38, %v484_v31  ;;  %v481_v40 = vrot.slane %v474_v38, %v480_v32  ;;  %vm678_vm12 = vcmask 777216   ;;  %vm712_vm13 = vcmask 769024  }
  0x2b   : > { %v375_v47 = vmul.f32 0.0009765625, %v359_v44  ;;  %v374_v48 = vadd.f32 %v373_v45, %v372_v46  ;;  %vm814_vm14 = vcmask 7168   ;;  %vm827_vm15 = vcmask 15368  }
  0x2d   : > { %v377_v49 = vmul.f32 %v375_v47, %v375_v47  ;;  %v376_v50 = vmul.f32 0.0009765625, %v374_v48 }
  0x2f   : > { %381 = vrot.lane.b32.xlu0 %v377_v49, %s1066_s15  ;;  %v378_v51 = vmul.f32 %v376_v50, %v376_v50 }
  0x33   : > { %383 = vrot.lane.b32.xlu0 %v378_v51, %s1066_s15  ;;  %s1070_s15 = smov 2  }
  0xa1   : > { %v382_v52 = vpop.permute.xlu0 %381 }
  0xa2   : > { %v387_v53 = vsub.f32 %v375_v47, %v382_v52 }
  0xa4   : > { %v391_v54 = vadd.f32 1e-05, %v387_v53 }
  0xa5   : > { %v384_v55 = vpop.permute.xlu0 %383 }
  0xa6   : > { %1038 = vrsqrt.f32 %v391_v54  ;;  %v388_v57 = vsub.f32 %v376_v50, %v384_v55 }
  0xa8   : > { %v392_v58 = vadd.f32 1e-05, %v388_v57 }
  0xaa   : > { %1040 = vrsqrt.f32 %v392_v58 }
  0xb0   : > { %v1039_v59 = vpop.eup %1038 }
  0xb1   : > { %397 = vrot.lane.b32.xlu1 %v1039_v59, %s1068_s16 }
  0xb4   : > { %v1041_v60 = vpop.eup %1040 }
  0xb5   : > { %399 = vrot.lane.b32.xlu1 %v1041_v60, %s1068_s16 }
 0x123   : > { %v398_v62 = vpop.permute.xlu1 %397 }
 0x124   : > { %v403_v63 = vmul.f32 %v398_v62, %v389_v61 }
 0x126   : > { %419 = vperm.xlu0 %1033, %v403_v63   ;;  %v407_v2 = vmul.f32 %v403_v63, %v375_v47 }
 0x127   : > { %v400_v1 = vpop.permute.xlu1 %399 }
 0x128   : > { %v404_v3 = vmul.f32 %v400_v1, %v390_v0  ;;  %v409_v7 = vsub.f32 %v405_v4, %v407_v2 }
 0x12a   : > { %v408_v6 = vmul.f32 %v404_v3, %v376_v50  ;;  %424 = vperm.xlu1 %1034, %v404_v3  }
 0x12c   : > { %v410_v8 = vsub.f32 %v406_v5, %v408_v6 }
 0x12e   : > { %433 = vperm.xlu1 %1034, %v409_v7   ;;  %438 = vperm.xlu0 %1033, %v410_v8  }
 0x1a5   : > { %v420_v13 = vpop.permute.xlu0 %419 }
 0x1a6   : > { %v427_v18 = vmul.f32 %v420_v13, %v413_v11  ;;  %v428_v19 = vmul.f32 %v420_v13, %v414_v12 }
 0x1a9   : > { %v425_v14 = vpop.permute.xlu1 %424 }
 0x1aa   : > { %v429_v23 = vmul.f32 %v425_v14, %v415_v16  ;;  %v430_v24 = vmul.f32 %v425_v14, %v416_v17 }
 0x1ad   : > { %v434_v20 = vpop.permute.xlu1 %433  ;;  %v439_v21 = vpop.permute.xlu0 %438 }
 0x1ae   : > { %v441_v25 = vadd.f32 %v434_v20, %v427_v18  ;;  %v442_v26 = vadd.f32 %v434_v20, %v428_v19  ;;  %v443_v29 = vadd.f32 %v439_v21, %v429_v23  ;;  %v444_v30 = vadd.f32 %v439_v21, %v430_v24 }
 0x1b0   : > { %v445_v27 = vmax.f32 %v441_v25, 0.0  ;;  %v446_v28 = vmax.f32 %v442_v26, 0.0  ;;  %v447_v34 = vmax.f32 %v443_v29, 0.0  ;;  %v448_v35 = vmax.f32 %v444_v30, 0.0 }
 0x1b2   : > { %455 = vrot.lane.b32.xlu0 %v446_v28, %s1069_s24  ;;  %453 = vrot.lane.b32.xlu1 %v445_v27, %s1069_s24 }
 0x1b6   : > { %459 = vrot.lane.b32.xlu0 %v448_v35, %s1069_s24  ;;  %457 = vrot.lane.b32.xlu1 %v447_v34, %s1069_s24 }
 0x1ba   : > { %526 = vrot.lane.b32.xlu0 %v523_v36, %s1070_s15  ;;  %524 = vrot.lane.b32.xlu1 %v519_v37, %s1070_s15  ;;  %s323_s15 = scalar_select %p322_p10, %s1135_s27, 3 }
 0x1be   : > { %559 = vrot.lane.b32.xlu0 %v485_v39, %s1071_s17  ;;  %557 = vrot.lane.b32.xlu1 %v481_v40, %s1071_s17  ;;  %s989_s17 = sshll.u32 %s323_s15, 4 }
 0x1c2   : > { %606 = vrot.lane.b32.xlu0 %v523_v36, %s1072_s18  ;;  %604 = vrot.lane.b32.xlu1 %v519_v37, %s1072_s18 }
 0x1c6   : > { %640 = vrot.lane.b32.xlu0 %v485_v39, %s1073_s19  ;;  %638 = vrot.lane.b32.xlu1 %v481_v40, %s1073_s19 }
 0x1ca   : > { %687 = vrot.lane.b32.xlu0 %v523_v36, %s1074_s20  ;;  %685 = vrot.lane.b32.xlu1 %v519_v37, %s1074_s20  ;;  %s326_s20 = scalar_lea.vmem %s1349_s7, %s989_s17 }
 0x224   : > { %v456_v41 = vpop.permute.xlu0 %455  ;;  %v454_v42 = vpop.permute.xlu1 %453 }
 0x225   : > { %v1243_v43 = vsel %vm461_vm1, %v454_v42, %v456_v41  ;;  %v1245_v44 = vsel %vm461_vm1, 0.0, %v454_v42  ;;  %v1247_v45 = vsel %vm461_vm1, %v456_v41, 0.0 }
 0x226   : > { %v489_v48 = vmul.f32 %v485_v39, %v1243_v43  ;;  %v488_v52 = vmul.f32 %v481_v40, %v1245_v44 }
 0x228   : > { %v460_v46 = vpop.permute.xlu0 %459  ;;  %v458_v47 = vpop.permute.xlu1 %457 }
 0x229   : > { %v1250_v49 = vsel %vm461_vm1, %v460_v46, 0.0  ;;  %v1252_v50 = vsel %vm461_vm1, %v458_v47, %v460_v46  ;;  %v1254_v51 = vsel %vm461_vm1, 0.0, %v458_v47 }
 0x22a   : > { %v1259_v53 = vpack.c.bf16 %v1250_v49, %v1247_v45  ;;  %v497_v54 = vpack.c.bf16 %v1252_v50, %v1243_v43  ;;  %v491_v55 = vmul.f32 %v485_v39, %v1252_v50  ;;  %v490_v56 = vmul.f32 %v481_v40, %v1254_v51 }
 0x22b   : > { %v1270_v61 = vpack.c.bf16 %v1254_v51, %v1245_v44 }
 0x22c   : > { %506 = vrot.lane.b32.xlu0 %v1259_v53, %s1068_s16  ;;  %v527_v57 = vpop.permute.xlu0 %526  ;;  %504 = vrot.lane.b32.xlu1 %v497_v54, %s1068_s16  ;;  %v525_v58 = vpop.permute.xlu1 %524  ;;  %v493_v59 = vpack.c.bf16 %v491_v55, %v489_v48  ;;  %v492_v60 = vpack.c.bf16 %v490_v56, %v488_v52  ;;  %v1037_v48 = vld [vmem:[%s1343_s1 + $0x4] ss:$8 sps:$4 sm:$0xff]  }
 0x22d   : > { %v528_v62 = vsel %vm344_vm0, %v525_v58, %v527_v57  ;;  %v534_v3 = vmul.f32 %v527_v57, %v1247_v45  ;;  %v537_v4 = vmul.f32 %v527_v57, %v1250_v49  ;;  %v532_v5 = vmul.f32 %v525_v58, %v1245_v44  ;;  %980 = vmatprep.mubr.msk.bf16.mxu0 %vm561_vm2, %v1037_v48 }
 0x22e   : > { %751 = vmatprep.subr.bf16.mxu0 %v493_v59  ;;  %v533_v63 = vmul.f32 %v528_v62, %v1243_v43  ;;  %v536_v0 = vmul.f32 %v528_v62, %v1252_v50  ;;  %v535_v6 = vmul.f32 %v525_v58, %v1254_v51 }
 0x22f   : > { %752 = vmatpush1.bf16.msra.mxu0 %v492_v60  ;;  %v540_v9 = vpack.c.bf16 %v537_v4, %v534_v3 }
 0x230   : > { %593 = vrot.lane.b32.xlu0 %v497_v54, %s1075_s21  ;;  %502 = vrot.lane.b32.xlu1 %v1270_v61, %s1068_s16  ;;  %v560_v1 = vpop.permute.xlu0 %559  ;;  %v558_v2 = vpop.permute.xlu1 %557  ;;  %v539_v7 = vpack.c.bf16 %v536_v0, %v533_v63  ;;  %s1076_s16 = smov 95   ;;  %v538_v10 = vpack.c.bf16 %v535_v6, %v532_v5 }
 0x231   : > { %v562_v8 = vsel %vm561_vm2, %v558_v2, %v560_v1  ;;  %v568_v11 = vmul.f32 %v560_v1, %v1247_v45  ;;  %v571_v12 = vmul.f32 %v560_v1, %v1250_v49  ;;  %v566_v17 = vmul.f32 %v558_v2, %v1245_v44 }
 0x232   : > { %v567_v13 = vmul.f32 %v562_v8, %v1243_v43  ;;  %v570_v14 = vmul.f32 %v562_v8, %v1252_v50  ;;  %v569_v18 = vmul.f32 %v558_v2, %v1254_v51 }
 0x233   : > { %v574_v19 = vpack.c.bf16 %v571_v12, %v568_v11 }
 0x234   : > { %591 = vrot.lane.b32.xlu0 %v1270_v61, %s1075_s21  ;;  %595 = vrot.lane.b32.xlu1 %v1259_v53, %s1075_s21  ;;  %v607_v15 = vpop.permute.xlu0 %606  ;;  %v605_v16 = vpop.permute.xlu1 %604  ;;  %v573_v20 = vpack.c.bf16 %v570_v14, %v567_v13  ;;  %v572_v24 = vpack.c.bf16 %v569_v18, %v566_v17 }
 0x235   : > { %v609_v21 = vsel %vm608_vm3, %v605_v16, %v607_v15  ;;  %v615_v25 = vmul.f32 %v607_v15, %v1247_v45  ;;  %v618_v26 = vmul.f32 %v607_v15, %v1250_v49  ;;  %v613_v30 = vmul.f32 %v605_v16, %v1245_v44 }
 0x236   : > { %v614_v27 = vmul.f32 %v609_v21, %v1243_v43  ;;  %v617_v28 = vmul.f32 %v609_v21, %v1252_v50  ;;  %v616_v31 = vmul.f32 %v605_v16, %v1254_v51 }
 0x237   : > { %v621_v34 = vpack.c.bf16 %v618_v26, %v615_v25 }
 0x238   : > { %674 = vrot.lane.b32.xlu1 %v497_v54, %s1076_s16  ;;  %546 = vrot.lane.b32.xlu0 %v539_v7, %s1077_s22  ;;  %v641_v22 = vpop.permute.xlu0 %640  ;;  %v639_v23 = vpop.permute.xlu1 %638  ;;  %v620_v35 = vpack.c.bf16 %v617_v28, %v614_v27  ;;  %v619_v39 = vpack.c.bf16 %v616_v31, %v613_v30 }
 0x239   : > { %v643_v29 = vsel %vm642_vm4, %v639_v23, %v641_v22  ;;  %v649_v38 = vmul.f32 %v641_v22, %v1247_v45  ;;  %v652_v40 = vmul.f32 %v641_v22, %v1250_v49  ;;  %v647_v41 = vmul.f32 %v639_v23, %v1245_v44 }
 0x23a   : > { %v648_v32 = vmul.f32 %v643_v29, %v1243_v43  ;;  %v651_v33 = vmul.f32 %v643_v29, %v1252_v50  ;;  %v650_v42 = vmul.f32 %v639_v23, %v1254_v51 }
 0x23b   : > { %v655_v54 = vpack.c.bf16 %v652_v40, %v649_v38 }
 0x23c   : > { %548 = vrot.lane.b32.xlu1 %v540_v9, %s1077_s22  ;;  %544 = vrot.lane.b32.xlu0 %v538_v10, %s1077_s22  ;;  %v688_v36 = vpop.permute.xlu0 %687  ;;  %v686_v37 = vpop.permute.xlu1 %685  ;;  %v654_v46 = vpack.c.bf16 %v651_v33, %v648_v32  ;;  %v653_v55 = vpack.c.bf16 %v650_v42, %v647_v41  ;;  %v1035_v33 = vld [vmem:[%s1343_s1] ss:$8 sps:$4 sm:$0xff]   ;;  %s844_s22 = scalar_lea.vmem (%p1147_p5), %s1348_s6, %s992_s30 }
 0x23d   : > { %v690_v47 = vsel %vm689_vm5, %v686_v37, %v688_v36  ;;  %v696_v56 = vmul.f32 %v688_v36, %v1247_v45  ;;  %v699_v57 = vmul.f32 %v688_v36, %v1250_v49  ;;  %v694_v58 = vmul.f32 %v686_v37, %v1245_v44 }
 0x23e   : > { %v695_v52 = vmul.f32 %v690_v47, %v1243_v43  ;;  %v697_v59 = vmul.f32 %v686_v37, %v1254_v51 }
 0x23f   : > { %v702_v43 = vpack.c.bf16 %v699_v57, %v696_v56 }
 0x240   : > { %582 = vrot.lane.b32.xlu0 %v574_v19, %s1078_s23  ;;  %580 = vrot.lane.b32.xlu1 %v573_v20, %s1078_s23 }
 0x244   : > { %676 = vrot.lane.b32.xlu0 %v1259_v53, %s1076_s16  ;;  %578 = vrot.lane.b32.xlu1 %v572_v24, %s1078_s23  ;;  %v698_v53 = vmul.f32 %v690_v47, %v1252_v50  ;;  %v700_v50 = vpack.c.bf16 %v697_v59, %v694_v58 }
 0x246   : > { %v701_v60 = vpack.c.bf16 %v698_v53, %v695_v52 }
 0x248   : > { %629 = vrot.lane.b32.xlu0 %v621_v34, %s1079_s29  ;;  %627 = vrot.lane.b32.xlu1 %v620_v35, %s1079_s29 }
 0x24c   : > { %625 = vrot.lane.b32.xlu1 %v619_v39, %s1079_s29  ;;  %661 = vrot.lane.b32.xlu0 %v654_v46, %s1080_s26 }
 0x250   : > { %663 = vrot.lane.b32.xlu1 %v655_v54, %s1080_s26  ;;  %659 = vrot.lane.b32.xlu0 %v653_v55, %s1080_s26 }
 0x254   : > { %672 = vrot.lane.b32.xlu1 %v1270_v61, %s1076_s16  ;;  %708 = vrot.lane.b32.xlu0 %v701_v60, %s1081_s11 }
 0x258   : > { %710 = vrot.lane.b32.xlu1 %v702_v43, %s1081_s11  ;;  %706 = vrot.lane.b32.xlu0 %v700_v50, %s1081_s11 }
 0x29e   : > { %v507_v62 = vpop.permute.xlu0 %506  ;;  %v505_v63 = vpop.permute.xlu1 %504 }
 0x29f   : > { %v510_v45 = vsel %vm508_vm6, %v505_v63, %v507_v62 }
 0x2a0   : > { %753 = vmatprep.subr.bf16.mxu0 %v510_v45 }
 0x2a2   : > { %v594_v49 = vpop.permute.xlu0 %593  ;;  %v503_v0 = vpop.permute.xlu1 %502 }
 0x2a3   : > { %v509_v44 = vsel %vm508_vm6, %v503_v0, %v505_v63 }
 0x2a4   : > { %754 = vmatpush1.bf16.msra.mxu0 %v509_v44 }
 0x2a6   : > { %v592_v51 = vpop.permute.xlu0 %591  ;;  %v596_v1 = vpop.permute.xlu1 %595 }
 0x2a7   : > { %v599_v13 = vsel %vm597_vm9, %v594_v49, %v596_v1  ;;  %v598_v16 = vsel %vm597_vm9, %v592_v51, %v594_v49 }
 0x2aa   : > { %v547_v2 = vpop.permute.xlu0 %546  ;;  %v675_v3 = vpop.permute.xlu1 %674 }
 0x2ae   : > { %v545_v61 = vpop.permute.xlu0 %544  ;;  %v549_v4 = vpop.permute.xlu1 %548 }
 0x2af   : > { %v552_v5 = vsel %vm550_vm7, %v547_v2, %v549_v4  ;;  %v551_v6 = vsel %vm550_vm7, %v545_v61, %v547_v2 }
 0x2b0   : > { %755 = vmatprep.subr.bf16.mxu0 %v552_v5 }
 0x2b1   : > { %756 = vmatpush1.bf16.msra.mxu0 %v551_v6 }
 0x2b2   : > { %v583_v7 = vpop.permute.xlu0 %582  ;;  %v581_v8 = vpop.permute.xlu1 %580 }
 0x2b3   : > { %v586_v9 = vsel %vm584_vm8, %v581_v8, %v583_v7 }
 0x2b4   : > { %757 = vmatprep.subr.bf16.mxu0 %v586_v9 }
 0x2b6   : > { %v677_v10 = vpop.permute.xlu0 %676  ;;  %v579_v11 = vpop.permute.xlu1 %578 }
 0x2b7   : > { %v585_v12 = vsel %vm584_vm8, %v579_v11, %v581_v8  ;;  %v680_v25 = vsel %vm678_vm12, %v675_v3, %v677_v10 }
 0x2b8   : > { %758 = vmatpush1.bf16.msra.mxu0 %v585_v12 }
 0x2b9   : > { %759 = vmatprep.subr.bf16.mxu0 %v599_v13 }
 0x2ba   : > { %v630_v14 = vpop.permute.xlu0 %629  ;;  %v628_v15 = vpop.permute.xlu1 %627 }
 0x2bb   : > { %v633_v17 = vsel %vm631_vm10, %v628_v15, %v630_v14 }
 0x2bc   : > { %760 = vmatpush1.bf16.msra.mxu0 %v598_v16 }
 0x2bd   : > { %761 = vmatprep.subr.bf16.mxu0 %v633_v17 }
 0x2be   : > { %v662_v18 = vpop.permute.xlu0 %661  ;;  %v626_v19 = vpop.permute.xlu1 %625 }
 0x2bf   : > { %v632_v20 = vsel %vm631_vm10, %v626_v19, %v628_v15 }
 0x2c0   : > { %762 = vmatpush1.bf16.msra.mxu0 %v632_v20 }
 0x2c2   : > { %v660_v21 = vpop.permute.xlu0 %659  ;;  %v664_v22 = vpop.permute.xlu1 %663 }
 0x2c3   : > { %v667_v23 = vsel %vm665_vm11, %v662_v18, %v664_v22  ;;  %v666_v24 = vsel %vm665_vm11, %v660_v21, %v662_v18 }
 0x2c4   : > { %763 = vmatprep.subr.bf16.mxu0 %v667_v23 }
 0x2c5   : > { %764 = vmatpush1.bf16.msra.mxu0 %v666_v24 }
 0x2c6   : > { %v709_v26 = vpop.permute.xlu0 %708  ;;  %765 = vmatprep.subr.bf16.mxu0 %v680_v25  ;;  %v673_v27 = vpop.permute.xlu1 %672 }
 0x2c7   : > { %v679_v28 = vsel %vm678_vm12, %v673_v27, %v675_v3 }
 0x2c9   : > { %766 = vmatpush1.bf16.msra.mxu0 %v679_v28 }
 0x2ca   : > { %v707_v29 = vpop.permute.xlu0 %706  ;;  %v711_v30 = vpop.permute.xlu1 %710 }
 0x2cb   : > { %v714_v31 = vsel %vm712_vm13, %v709_v26, %v711_v30  ;;  %v713_v32 = vsel %vm712_vm13, %v707_v29, %v709_v26 }
 0x2cc   : > { %767 = vmatprep.subr.bf16.mxu0 %v714_v31 }
 0x2cd   : > { %768 = vmatpush1.bf16.msra.mxu0 %v713_v32 }
 0x2d0   : > { %784 = vmatmul.mubr.bf16.vlgmr.msra.gmra.mrb[0].mxu0 %v1035_v33 }
 0x3a3   : > { %v785_v34 = vpop.f32.mrb[0].mxu0 }
 0x3a4   : > { %v787_v35 = vpop.f32.mrb[1].mxu0  ;;  %v817_v36 = vmul.f32 %v785_v34, %v785_v34 }
 0x3a5   : > { %v990_v37 = vpack.c.bf16 %v787_v35, %v785_v34  ;;  %v789_v38 = vpop.f32.mrb[2].mxu0  ;;  %v808_v39 = vadd.f32 %v787_v35, %v785_v34  ;;  %v818_v40 = vmul.f32 %v787_v35, %v787_v35 }
 0x3a6   : > { %v791_v41 = vpop.f32.mrb[3].mxu0  ;;  %v819_v42 = vmul.f32 %v789_v38, %v789_v38 }
 0x3a7   : > { %v991_v46 = vpack.c.bf16 %v791_v41, %v789_v38  ;;  %806 = vst [vmem:[%s312_s14] sm:$0xff] %v990_v37  ;;  %v820_v47 = vmul.f32 %v791_v41, %v791_v41  ;;  %809 = vadd.xlane.f32.xlu1 %v808_v39  ;;  %v811_v48 = vadd.f32 %v791_v41, %v789_v38 }
 0x3a8   : > { %v821_v52 = vadd.f32 %v818_v40, %v817_v36 }
 0x3a9   : > { %807 = vst [vmem:[%s312_s14 + $0x8] sm:$0xff] %v991_v46  ;;  %812 = vadd.xlane.f32.xlu0 %v811_v48  ;;  %v824_v53 = vadd.f32 %v820_v47, %v819_v42 }
 0x3ab   : > { %825 = vadd.xlane.f32.xlu1 %v824_v53 }
 0x3ad   : > { %822 = vadd.xlane.f32.xlu0 %v821_v52 }
 0x3ae   : > { %v874_v58 = vld [vmem:[%s312_s14] sm:$0xff] (%p1147_p5) }
 0x3af   : > { %875 = vst [vmem:[%s844_s22] sm:$0xff] (%p1147_p5), %v874_v58 }
 0x3b0   : > { %v876_v59 = vld [vmem:[%s312_s14 + $0x8] sm:$0xff] (%p1147_p5) }
 0x3b1   : > { %877 = vst [vmem:[%s844_s22 + $0x20] sm:$0xff] (%p1147_p5), %v876_v59 }
 0x434   : > { %v810_v54 = vpop.xlane.xlu1 %809 }
 0x435   : > { %815 = vst.msk [vmem:[%s326_s20] sm:$0xff] %vm814_vm14, %v810_v54  ;;  %841 = sbr.rel (!%p1147_p5) target bundleno = 1084 (0x43c), region = 86 }
 0x436   : > { %v813_v55 = vpop.xlane.xlu0 %812 }
 0x437   : > { %816 = vst.msk [vmem:[%s326_s20 + $0x8] sm:$0xff] %vm814_vm14, %v813_v55 }
 0x438   : > { %v826_v56 = vpop.xlane.xlu1 %825 }
 0x439   : > { %829 = vst.msk [vmem:[%s326_s20 + $0x8] sm:$0xff] %vm827_vm15, %v826_v56 }
 0x43a   : > { %v823_v57 = vpop.xlane.xlu0 %822 }
 0x43b   : > { %828 = vst.msk [vmem:[%s326_s20] sm:$0xff] %vm827_vm15, %v823_v57 }
 0x43c PF: > { %p15_p11 = scmp.ge.s32.totalorder %s1137_s28, 6   ;;  %s1351_s24 = smov %s1060_s25 }
 0x43d   : > { %s1352_s25 = smov %s1145_s8  ;;  %s1353_s26 = smov %s1137_s28 }
 0x43e   :  { %17 = sbr.rel (!%p15_p11) target bundleno = 2 (0x2), region = 168 }

// kernel: bottleneck_forward.7
= control target key start
LH: loop header
LB: loop body
LE: loop exit
PB: predicated region body
PF: predicated region fallthrough
CT: control target
= control target key end

     0   :  { %s1123_s18 = smov 0   ;;  %s1125_s19 = smov 0   ;;  %s1588_s0 = inlined_call_operand.vmem [shape: bf16[64,1024], index: 0, kind: input, shape index: {}]   ;;  %s1589_s1 = inlined_call_operand.vmem [shape: f32[64,1024], index: 1, kind: input, shape index: {}]   ;;  %s1590_s2 = inlined_call_operand.vmem [shape: f32[8,64,2], index: 2, kind: input, shape index: {}]   ;;  %s1591_s3 = inlined_call_operand.vmem [shape: f32[64,1], index: 3, kind: input, shape index: {}]   ;;  %s1592_s4 = inlined_call_operand.vmem [shape: f32[64,1], index: 4, kind: input, shape index: {}]   ;;  %s1593_s5 = inlined_call_operand.vmem [shape: f32[64,1024], index: 5, kind: output, shape index: {}]  }
   0x1   :  { %s1127_s20 = smov 0  }
   0x2 LB: > { %s986_s21 = sadd.s32 4294967295, %s1088_s20   ;;  %s1140_s22 = sadd.s32 1, %s1088_s20   ;;  %s1088_s20 = sphi %s1127_s20, %s1598_s20   ;;  %s1084_s19 = sphi %s1125_s19, %s1597_s19   ;;  %s1080_s18 = sphi %s1123_s18, %s1596_s18  }
   0x3   : > { %s19_s23 = ssub.s32 %s1088_s20, %s1140_s22  ;;  %s22_s24 = sadd.s32 1, %s1084_s19 }
   0x4   : > { %p20_p0 = scmp.eq.s32.totalorder %s19_s23, 0  ;;  %p29_p1 = scmp.ne.s32.totalorder %s1084_s19, %s1080_s18 }
   0x5   : > { %p30_p2 = scmp.eq.s32.totalorder %s1088_s20, 0  ;;  %p148_p3 = scmp.eq.s32.totalorder %s986_s21, 7 }
   0x6   : > { %s1151_s25 = scalar_select %p20_p0, %s1084_s19, %s22_s24  }
   0x7   : > { %p1153_p4 = por %p30_p2, %p29_p1  ;;  %p1157_p5 = por %p148_p3, %p29_p1 }
   0x8   : > { %p989_p6 = scmp.ge.s32.totalorder %s1088_s20, 8 }
   0xa   : > { %179 = sbr.rel (%p989_p6) target bundleno = 41 (0x29), region = 28 }
  0x11   : > { %182 = sbr.rel (!%p1153_p4) target bundleno = 29 (0x1d), region = 32  ;;  %s184_s28 = sand.u32 (%p1153_p4), 1, %s1084_s19  }
  0x12   : > { %s991_s29 = sshll.u32 (%p1153_p4), %s1088_s20, 2  ;;  %s990_s30 = sshll.u32 (%p1153_p4), %s184_s28, 5 }
  0x13   : > { %s188_s8 = scalar_lea.vmem (%p1153_p4), %s1588_s0, %s991_s29  ;;  %s186_s9 = scalar_lea.vmem (%p1153_p4), [#allocation2], %s990_s30 }
  0x14   : > { %v204_v0 = vld [vmem:[%s188_s8] sm:$0xf] (%p1153_p4) }
  0x15   : > { %v206_v1 = vld [vmem:[%s188_s8 + $0x20] sm:$0xf] (%p1153_p4)  ;;  %205 = vst [vmem:[%s186_s9] sm:$0xf] (%p1153_p4), %v204_v0 }
  0x16   : > { %207 = vst [vmem:[%s186_s9 + $0x4] sm:$0xf] (%p1153_p4), %v206_v1  ;;  %v208_v2 = vld [vmem:[%s188_s8 + $0x40] sm:$0xf] (%p1153_p4) }
  0x17   : > { %v210_v3 = vld [vmem:[%s188_s8 + $0x60] sm:$0xf] (%p1153_p4)  ;;  %209 = vst [vmem:[%s186_s9 + $0x8] sm:$0xf] (%p1153_p4), %v208_v2 }
  0x18   : > { %v212_v4 = vld [vmem:[%s188_s8 + $0x80] sm:$0xf]  ;;  %211 = vst [vmem:[%s186_s9 + $0xc] sm:$0xf] %v210_v3 }
  0x19   : > { %213 = vst [vmem:[%s186_s9 + $0x10] sm:$0xf] %v212_v4  ;;  %v214_v5 = vld [vmem:[%s188_s8 + $0xa0] sm:$0xf] }
  0x1a   : > { %v216_v6 = vld [vmem:[%s188_s8 + $0xc0] sm:$0xf]  ;;  %215 = vst [vmem:[%s186_s9 + $0x14] sm:$0xf] %v214_v5 }
  0x1b   : > { %v218_v7 = vld [vmem:[%s188_s8 + $0xe0] sm:$0xf]  ;;  %217 = vst [vmem:[%s186_s9 + $0x18] sm:$0xf] %v216_v6 }
  0x1c   : > { %219 = vst [vmem:[%s186_s9 + $0x1c] sm:$0xf] %v218_v7 }
  0x1d PF: > { %258 = sbr.rel (!%p1153_p4) target bundleno = 41 (0x29), region = 73  ;;  %s260_s10 = sand.u32 (%p1153_p4), 1, %s1084_s19  }
  0x1e   : > { %s993_s11 = sshll.u32 (%p1153_p4), %s1088_s20, 3  ;;  %s992_s12 = sshll.u32 (%p1153_p4), %s260_s10, 6 }
  0x1f   : > { %s264_s15 = scalar_lea.vmem (%p1153_p4), %s1589_s1, %s993_s11  ;;  %s262_s16 = scalar_lea.vmem (%p1153_p4), [#allocation3], %s992_s12 }
  0x20   : > { %v306_v8 = vld [vmem:[%s264_s15] sm:$0xff] (%p1153_p4) }
  0x21   : > { %v308_v9 = vld [vmem:[%s264_s15 + $0x40] sm:$0xff] (%p1153_p4)  ;;  %307 = vst [vmem:[%s262_s16] sm:$0xff] (%p1153_p4), %v306_v8 }
  0x22   : > { %v310_v10 = vld [vmem:[%s264_s15 + $0x80] sm:$0xff] (%p1153_p4)  ;;  %309 = vst [vmem:[%s262_s16 + $0x8] sm:$0xff] (%p1153_p4), %v308_v9 }
  0x23   : > { %311 = vst [vmem:[%s262_s16 + $0x10] sm:$0xff] (%p1153_p4), %v310_v10  ;;  %v312_v11 = vld [vmem:[%s264_s15 + $0xc0] sm:$0xff] (%p1153_p4) }
  0x24   : > { %v314_v12 = vld [vmem:[%s264_s15 + $0x100] sm:$0xff]  ;;  %313 = vst [vmem:[%s262_s16 + $0x18] sm:$0xff] %v312_v11 }
  0x25   : > { %v316_v13 = vld [vmem:[%s264_s15 + $0x140] sm:$0xff]  ;;  %315 = vst [vmem:[%s262_s16 + $0x20] sm:$0xff] %v314_v12 }
  0x26   : > { %317 = vst [vmem:[%s262_s16 + $0x28] sm:$0xff] %v316_v13  ;;  %v318_v14 = vld [vmem:[%s264_s15 + $0x180] sm:$0xff] }
  0x27   : > { %v320_v15 = vld [vmem:[%s264_s15 + $0x1c0] sm:$0xff]  ;;  %319 = vst [vmem:[%s262_s16 + $0x30] sm:$0xff] %v318_v14 }
  0x28   : > { %321 = vst [vmem:[%s262_s16 + $0x38] sm:$0xff] %v320_v15 }
  0x29 PF: > { %p994_p7 = scmp.ge.s32.totalorder %s1088_s20, 1  ;;  %p326_p8 = scmp.lt.s32.totalorder %s1088_s20, 9 }
  0x2b   : > { %p327_p9 = pnand %p994_p7, %p326_p8 }
  0x2c   : > { %v370_v16 = vld [vmem:[%s1590_s2] sm:$0xff] (!%p327_p9)  ;;  %vm434_vm0 = vcmask (!%p327_p9), 15360   ;;  %v372_v28 = vld [vmem:[%s1590_s2 + $0x10] sm:$0xff] (!%p327_p9)  ;;  %v371_v47 = vld [vmem:[%s1590_s2 + $0x8] sm:$0xff] (!%p327_p9)  ;;  %s1090_s15 = smov (!%p327_p9), 1   ;;  %s333_s24 = sand.u32 (!%p327_p9), 1, %s1080_s18  }
  0x2d   : > { %330 = sbr.rel (%p327_p9) target bundleno = 496 (0x1f0), region = 111  ;;  %v378_v17 = vld [vmem:[%s1590_s2 + $0x40] sm:$0xff] (!%p327_p9)  ;;  %v435_v22 = vsel (!%p327_p9), %vm434_vm0, %v370_v16, 0.0  ;;  %v380_v31 = vld [vmem:[%s1590_s2 + $0x50] sm:$0xff] (!%p327_p9)  ;;  %v465_v34 = vsel (!%p327_p9), %vm434_vm0, %v372_v28, 0.0  ;;  %v379_v48 = vld [vmem:[%s1590_s2 + $0x48] sm:$0xff] (!%p327_p9) }
  0x2e   : > { %v386_v18 = vld [vmem:[%s1590_s2 + $0x80] sm:$0xff] (!%p327_p9)  ;;  %v436_v23 = vsel (!%p327_p9), %vm434_vm0, %v378_v17, 0.0  ;;  %v388_v32 = vld [vmem:[%s1590_s2 + $0x90] sm:$0xff] (!%p327_p9)  ;;  %v466_v40 = vsel (!%p327_p9), %vm434_vm0, %v380_v31, 0.0  ;;  %v387_v51 = vld [vmem:[%s1590_s2 + $0x88] sm:$0xff] (!%p327_p9)  ;;  %v450_v54 = vsel (!%p327_p9), %vm434_vm0, %v371_v47, 0.0 }
  0x2f   : > { %v394_v19 = vld [vmem:[%s1590_s2 + $0xc0] sm:$0xff] (!%p327_p9)  ;;  %v438_v24 = vsel (!%p327_p9), %vm434_vm0, %v386_v18, 0.0  ;;  %v437_v27 = vadd.f32 (!%p327_p9), %v436_v23, %v435_v22  ;;  %v396_v33 = vld [vmem:[%s1590_s2 + $0xd0] sm:$0xff] (!%p327_p9)  ;;  %v468_v41 = vsel (!%p327_p9), %vm434_vm0, %v388_v32, 0.0  ;;  %v467_v45 = vadd.f32 (!%p327_p9), %v466_v40, %v465_v34  ;;  %v395_v52 = vld [vmem:[%s1590_s2 + $0xc8] sm:$0xff] (!%p327_p9)  ;;  %s995_s26 = sshll.u32 (!%p327_p9), %s333_s24, 5 }
  0x30   : > { %v402_v20 = vld [vmem:[%s1590_s2 + $0x100] sm:$0xff] (!%p327_p9)  ;;  %v440_v29 = vsel (!%p327_p9), %vm434_vm0, %v394_v19, 0.0  ;;  %v404_v37 = vld [vmem:[%s1590_s2 + $0x110] sm:$0xff] (!%p327_p9)  ;;  %v470_v46 = vsel (!%p327_p9), %vm434_vm0, %v396_v33, 0.0  ;;  %v403_v53 = vld [vmem:[%s1590_s2 + $0x108] sm:$0xff] (!%p327_p9)  ;;  %v451_v55 = vsel (!%p327_p9), %vm434_vm0, %v379_v48, 0.0 }
  0x31   : > { %v410_v21 = vld [vmem:[%s1590_s2 + $0x140] sm:$0xff] (!%p327_p9)  ;;  %v442_v30 = vsel (!%p327_p9), %vm434_vm0, %v402_v20, 0.0  ;;  %v439_v35 = vadd.f32 (!%p327_p9), %v438_v24, %v437_v27  ;;  %v412_v38 = vld [vmem:[%s1590_s2 + $0x150] sm:$0xff] (!%p327_p9)  ;;  %v472_v50 = vsel (!%p327_p9), %vm434_vm0, %v404_v37, 0.0  ;;  %v469_v56 = vadd.f32 (!%p327_p9), %v468_v41, %v467_v45  ;;  %v411_v58 = vld [vmem:[%s1590_s2 + $0x148] sm:$0xff] (!%p327_p9)  ;;  %s1539_s28 = sshll.u32 (!%p327_p9), %s333_s24, 6 }
  0x32   : > { %v418_v25 = vld [vmem:[%s1590_s2 + $0x180] sm:$0xff] (!%p327_p9)  ;;  %v444_v36 = vsel (!%p327_p9), %vm434_vm0, %v410_v21, 0.0  ;;  %v420_v39 = vld [vmem:[%s1590_s2 + $0x190] sm:$0xff] (!%p327_p9)  ;;  %v474_v57 = vsel (!%p327_p9), %vm434_vm0, %v412_v38, 0.0  ;;  %v419_v59 = vld [vmem:[%s1590_s2 + $0x188] sm:$0xff] (!%p327_p9)  ;;  %v452_v60 = vadd.f32 (!%p327_p9), %v451_v55, %v450_v54  ;;  %v453_v61 = vsel (!%p327_p9), %vm434_vm0, %v387_v51, 0.0 }
  0x33   : > { %v426_v26 = vld [vmem:[%s1590_s2 + $0x1c0] sm:$0xff] (!%p327_p9)  ;;  %v446_v42 = vsel (!%p327_p9), %vm434_vm0, %v418_v25, 0.0  ;;  %v428_v44 = vld [vmem:[%s1590_s2 + $0x1d0] sm:$0xff] (!%p327_p9)  ;;  %v441_v49 = vadd.f32 (!%p327_p9), %v440_v29, %v439_v35  ;;  %v476_v63 = vsel (!%p327_p9), %vm434_vm0, %v420_v39, 0.0  ;;  %v455_v1 = vsel (!%p327_p9), %vm434_vm0, %v395_v52, 0.0  ;;  %v373_v2 = vld [vmem:[%s1590_s2 + $0x18] sm:$0xff] (!%p327_p9) }
  0x34   : > { %v448_v43 = vsel %vm434_vm0, %v426_v26, 0.0  ;;  %v478_v0 = vsel %vm434_vm0, %v428_v44, 0.0  ;;  %v381_v3 = vld [vmem:[%s1590_s2 + $0x58] sm:$0xff]  ;;  %v471_v5 = vadd.f32 %v470_v46, %v469_v56  ;;  %v427_v6 = vld [vmem:[%s1590_s2 + $0x1c8] sm:$0xff]  ;;  %v454_v7 = vadd.f32 %v453_v61, %v452_v60  ;;  %v374_v45 = vld [vmem:[%s1590_s2 + $0x20] sm:$0xff]  ;;  %s1542_s29 = scalar_lea.vmem [#allocation3], %s1539_s28 }
  0x35   : > { %v443_v62 = vadd.f32 %v442_v30, %v441_v49  ;;  %v389_v4 = vld [vmem:[%s1590_s2 + $0x98] sm:$0xff]  ;;  %v457_v8 = vsel %vm434_vm0, %v403_v53, 0.0  ;;  %v480_v11 = vsel %vm434_vm0, %v373_v2, 0.0  ;;  %v459_v13 = vsel %vm434_vm0, %v411_v58, 0.0  ;;  %v375_v16 = vld [vmem:[%s1590_s2 + $0x28] sm:$0xff]  ;;  %v390_v55 = vld [vmem:[%s1590_s2 + $0xa0] sm:$0xff] }
  0x36   : > { %v397_v9 = vld [vmem:[%s1590_s2 + $0xd8] sm:$0xff]  ;;  %v481_v14 = vsel %vm434_vm0, %v381_v3, 0.0  ;;  %v483_v15 = vsel %vm434_vm0, %v389_v4, 0.0  ;;  %v473_v17 = vadd.f32 %v472_v50, %v471_v5  ;;  %v456_v18 = vadd.f32 %v455_v1, %v454_v7  ;;  %v383_v22 = vld [vmem:[%s1590_s2 + $0x68] sm:$0xff]  ;;  %v398_v56 = vld [vmem:[%s1590_s2 + $0xe0] sm:$0xff]  ;;  %s1548_s18 = scalar_lea.vmem [#allocation4], %s1539_s28 }
  0x37   : > { %v405_v10 = vld [vmem:[%s1590_s2 + $0x118] sm:$0xff]  ;;  %v445_v12 = vadd.f32 %v444_v36, %v443_v62  ;;  %v461_v19 = vsel %vm434_vm0, %v419_v59, 0.0  ;;  %v482_v21 = vadd.f32 %v481_v14, %v480_v11  ;;  %v391_v23 = vld [vmem:[%s1590_s2 + $0xa8] sm:$0xff]  ;;  %v463_v25 = vsel %vm434_vm0, %v427_v6, 0.0  ;;  %v406_v2 = vld [vmem:[%s1590_s2 + $0x120] sm:$0xff]  ;;  %s999_s30 = sshll.u32 (%p1157_p5), %s986_s21, 3 }
  0x38   : > { %v413_v20 = vld [vmem:[%s1590_s2 + $0x158] sm:$0xff]  ;;  %v485_v26 = vsel %vm434_vm0, %v397_v9, 0.0  ;;  %v487_v27 = vsel %vm434_vm0, %v405_v10, 0.0  ;;  %v475_v28 = vadd.f32 %v474_v57, %v473_v17  ;;  %v458_v29 = vadd.f32 %v457_v8, %v456_v18  ;;  %v399_v33 = vld [vmem:[%s1590_s2 + $0xe8] sm:$0xff]  ;;  %s851_s8 = scalar_lea.vmem (%p1157_p5), %s1593_s5, %s999_s30 }
  0x39   : > { %v447_v24 = vadd.f32 %v446_v42, %v445_v12  ;;  %v421_v30 = vld [vmem:[%s1590_s2 + $0x198] sm:$0xff]  ;;  %v484_v32 = vadd.f32 %v483_v15, %v482_v21  ;;  %v510_v34 = vsel %vm434_vm0, %v375_v16, 0.0  ;;  %v489_v36 = vsel %vm434_vm0, %v413_v20, 0.0  ;;  %v407_v42 = vld [vmem:[%s1590_s2 + $0x128] sm:$0xff]  ;;  %v414_v16 = vld [vmem:[%s1590_s2 + $0x160] sm:$0xff] }
  0x3a   : > { %v429_v31 = vld [vmem:[%s1590_s2 + $0x1d8] sm:$0xff]  ;;  %v511_v37 = vsel %vm434_vm0, %v383_v22, 0.0  ;;  %v513_v38 = vsel %vm434_vm0, %v391_v23, 0.0  ;;  %v477_v39 = vadd.f32 %v476_v63, %v475_v28  ;;  %v460_v40 = vadd.f32 %v459_v13, %v458_v29  ;;  %v415_v53 = vld [vmem:[%s1590_s2 + $0x168] sm:$0xff]  ;;  %v422_v22 = vld [vmem:[%s1590_s2 + $0x1a0] sm:$0xff] }
  0x3b   : > { %v449_v35 = vadd.f32 %v448_v43, %v447_v24  ;;  %v486_v41 = vadd.f32 %v485_v26, %v484_v32  ;;  %v512_v44 = vadd.f32 %v511_v37, %v510_v34  ;;  %v382_v43 = vld [vmem:[%s1590_s2 + $0x60] sm:$0xff]  ;;  %v491_v47 = vsel %vm434_vm0, %v421_v30, 0.0  ;;  %v377_v7 = vld [vmem:[%s1590_s2 + $0x38] sm:$0xff]  ;;  %v431_v11 = vld [vmem:[%s1590_s2 + $0x1e8] sm:$0xff] }
  0x3c   : > { %v493_v48 = vsel %vm434_vm0, %v429_v31, 0.0  ;;  %v515_v49 = vsel %vm434_vm0, %v399_v33, 0.0  ;;  %v479_v50 = vadd.f32 %v478_v0, %v477_v39  ;;  %v462_v51 = vadd.f32 %v461_v19, %v460_v40  ;;  %v423_v0 = vld [vmem:[%s1590_s2 + $0x1a8] sm:$0xff]  ;;  %v385_v13 = vld [vmem:[%s1590_s2 + $0x78] sm:$0xff]  ;;  %v376_v29 = vld [vmem:[%s1590_s2 + $0x30] sm:$0xff] }
  0x3d   : > { %v1328_v46 = vmul.f32 0.0009765625, %v449_v35  ;;  %v488_v52 = vadd.f32 %v487_v27, %v486_v41  ;;  %v514_v54 = vadd.f32 %v513_v38, %v512_v44  ;;  %v517_v58 = vsel %vm434_vm0, %v407_v42, 0.0  ;;  %v393_v14 = vld [vmem:[%s1590_s2 + $0xb8] sm:$0xff]  ;;  %v384_v35 = vld [vmem:[%s1590_s2 + $0x70] sm:$0xff]  ;;  %v430_v37 = vld [vmem:[%s1590_s2 + $0x1e0] sm:$0xff] }
  0x3e   : > { %v495_v59 = vsel %vm434_vm0, %v374_v45, 0.0  ;;  %v496_v60 = vsel %vm434_vm0, %v382_v43, 0.0  ;;  %v1347_v61 = vmul.f32 0.0009765625, %v479_v50  ;;  %v464_v62 = vadd.f32 %v463_v25, %v462_v51  ;;  %v401_v23 = vld [vmem:[%s1590_s2 + $0xf8] sm:$0xff]  ;;  %v400_v43 = vld [vmem:[%s1590_s2 + $0xf0] sm:$0xff] }
  0x3f   : > { %v563_v57 = vmul.f32 %v1328_v46, %v1328_v46  ;;  %v490_v63 = vadd.f32 %v489_v36, %v488_v52  ;;  %v516_v1 = vadd.f32 %v515_v49, %v514_v54  ;;  %v519_v3 = vsel %vm434_vm0, %v415_v53, 0.0  ;;  %v409_v33 = vld [vmem:[%s1590_s2 + $0x138] sm:$0xff]  ;;  %v392_v36 = vld [vmem:[%s1590_s2 + $0xb0] sm:$0xff] }
  0x40   : > { %v497_v4 = vadd.f32 %v496_v60, %v495_v59  ;;  %v498_v5 = vsel %vm434_vm0, %v390_v55, 0.0  ;;  %v500_v6 = vsel %vm434_vm0, %v398_v56, 0.0  ;;  %v565_v8 = vmul.f32 %v1347_v61, %v1347_v61  ;;  %v417_v44 = vld [vmem:[%s1590_s2 + $0x178] sm:$0xff]  ;;  %v408_v56 = vld [vmem:[%s1590_s2 + $0x130] sm:$0xff] }
  0x41   : > { %579 = vrot.lane.b32.xlu0 %v563_v57, %s1090_s15  ;;  %v1364_v9 = vmul.f32 0.0009765625, %v464_v62  ;;  %v492_v10 = vadd.f32 %v491_v47, %v490_v63  ;;  %v518_v12 = vadd.f32 %v517_v58, %v516_v1  ;;  %v521_v15 = vsel %vm434_vm0, %v423_v0, 0.0  ;;  %v425_v54 = vld [vmem:[%s1590_s2 + $0x1b8] sm:$0xff]  ;;  %v416_v1 = vld [vmem:[%s1590_s2 + $0x170] sm:$0xff] }
  0x42   : > { %v499_v17 = vadd.f32 %v498_v5, %v497_v4  ;;  %v502_v18 = vsel %vm434_vm0, %v406_v2, 0.0  ;;  %583 = vrot.lane.b32.xlu1 %v565_v8, %s1090_s15  ;;  %v540_v24 = vsel %vm434_vm0, %v377_v7, 0.0  ;;  %v523_v25 = vsel %vm434_vm0, %v431_v11, 0.0  ;;  %v433_v63 = vld [vmem:[%s1590_s2 + $0x1f8] sm:$0xff]  ;;  %v424_v7 = vld [vmem:[%s1590_s2 + $0x1b0] sm:$0xff] }
  0x43   : > { %v564_v19 = vmul.f32 %v1364_v9, %v1364_v9  ;;  %v494_v20 = vadd.f32 %v493_v48, %v492_v10  ;;  %v520_v21 = vadd.f32 %v519_v3, %v518_v12  ;;  %v541_v27 = vsel %vm434_vm0, %v385_v13, 0.0 }
  0x44   : > { %v501_v26 = vadd.f32 %v500_v6, %v499_v17  ;;  %v543_v28 = vsel %vm434_vm0, %v393_v14, 0.0  ;;  %v504_v32 = vsel %vm434_vm0, %v414_v16, 0.0  ;;  %v542_v34 = vadd.f32 %v541_v27, %v540_v24  ;;  %v432_v14 = vld [vmem:[%s1590_s2 + $0x1f0] sm:$0xff] }
  0x45   : > { %581 = vrot.lane.b32.xlu0 %v564_v19, %s1090_s15  ;;  %v1397_v30 = vmul.f32 0.0009765625, %v494_v20  ;;  %v522_v31 = vadd.f32 %v521_v15, %v520_v21  ;;  %v506_v39 = vsel %vm434_vm0, %v422_v22, 0.0  ;;  %v545_v40 = vsel %vm434_vm0, %v401_v23, 0.0 }
  0x46   : > { %v503_v38 = vadd.f32 %v502_v18, %v501_v26  ;;  %v544_v45 = vadd.f32 %v543_v28, %v542_v34  ;;  %v525_v47 = vsel %vm434_vm0, %v376_v29, 0.0  ;;  %v547_v49 = vsel %vm434_vm0, %v409_v33, 0.0 }
  0x47   : > { %v566_v41 = vmul.f32 %v1397_v30, %v1397_v30  ;;  %v524_v42 = vadd.f32 %v523_v25, %v522_v31  ;;  %v526_v50 = vsel %vm434_vm0, %v384_v35, 0.0  ;;  %v528_v51 = vsel %vm434_vm0, %v392_v36, 0.0 }
  0x48   : > { %v505_v48 = vadd.f32 %v504_v32, %v503_v38  ;;  %v508_v53 = vsel %vm434_vm0, %v430_v37, 0.0  ;;  %v546_v55 = vadd.f32 %v545_v40, %v544_v45  ;;  %v527_v57 = vadd.f32 %v526_v50, %v525_v47 }
  0x49   : > { %585 = vrot.lane.b32.xlu1 %v566_v41, %s1090_s15  ;;  %v1427_v52 = vmul.f32 0.0009765625, %v524_v42  ;;  %v549_v59 = vsel %vm434_vm0, %v417_v44, 0.0  ;;  %v530_v60 = vsel %vm434_vm0, %v400_v43, 0.0  ;;  %v551_v4 = vsel %vm434_vm0, %v425_v54, 0.0 }
  0x4a   : > { %v507_v58 = vadd.f32 %v506_v39, %v505_v48  ;;  %v548_v0 = vadd.f32 %v547_v49, %v546_v55  ;;  %v529_v2 = vadd.f32 %v528_v51, %v527_v57  ;;  %v532_v5 = vsel %vm434_vm0, %v408_v56, 0.0 }
  0x4b   : > { %v568_v62 = vmul.f32 %v1427_v52, %v1427_v52  ;;  %v553_v11 = vsel %vm434_vm0, %v433_v63, 0.0  ;;  %v534_v12 = vsel %vm434_vm0, %v416_v1, 0.0  ;;  %v536_v17 = vsel %vm434_vm0, %v424_v7, 0.0 }
  0x4c   : > { %v509_v3 = vadd.f32 %v508_v53, %v507_v58  ;;  %v550_v6 = vadd.f32 %v549_v59, %v548_v0  ;;  %v531_v8 = vadd.f32 %v530_v60, %v529_v2  ;;  %v538_v20 = vsel %vm434_vm0, %v432_v14, 0.0  ;;  %v611_v0 = vld [vmem:[%s1591_s3] sm:$0xff]  ;;  %v616_v14 = vld [vmem:[%s1591_s3 + $0x28] sm:$0xff] }
  0x4d   : > { %589 = vrot.lane.b32.xlu1 %v568_v62, %s1090_s15  ;;  %v1091_v36 = vmov 0  }
  0x4e   : > { %v1452_v10 = vmul.f32 0.0009765625, %v509_v3  ;;  %v552_v13 = vadd.f32 %v551_v4, %v550_v6  ;;  %v533_v15 = vadd.f32 %v532_v5, %v531_v8  ;;  %1048 = vset.pattern.permute.xlu0 %v1091_v36  ;;  %1049 = vset.pattern.permute.xlu1 %v1091_v36  ;;  %v612_v3 = vld [vmem:[%s1591_s3 + $0x8] sm:$0xff]  ;;  %v613_v6 = vld [vmem:[%s1591_s3 + $0x10] sm:$0xff]  ;;  %v614_v8 = vld [vmem:[%s1591_s3 + $0x18] sm:$0xff] }
  0x50   : > { %v567_v16 = vmul.f32 %v1452_v10, %v1452_v10  ;;  %v554_v18 = vadd.f32 %v553_v11, %v552_v13  ;;  %v535_v19 = vadd.f32 %v534_v12, %v533_v15 }
  0x52   : > { %587 = vrot.lane.b32.xlu0 %v567_v16, %s1090_s15  ;;  %v1464_v21 = vmul.f32 0.0009765625, %v554_v18  ;;  %v537_v22 = vadd.f32 %v536_v17, %v535_v19  ;;  %v615_v17 = vld [vmem:[%s1591_s3 + $0x20] sm:$0xff] }
  0x54   : > { %v570_v23 = vmul.f32 %v1464_v21, %v1464_v21  ;;  %v539_v24 = vadd.f32 %v538_v20, %v537_v22  ;;  %v618_v20 = vld [vmem:[%s1591_s3 + $0x38] sm:$0xff] }
  0x56   : > { %593 = vrot.lane.b32.xlu1 %v570_v23, %s1090_s15  ;;  %v1469_v25 = vmul.f32 0.0009765625, %v539_v24 }
  0x58   : > { %v569_v26 = vmul.f32 %v1469_v25, %v1469_v25 }
  0x5a   : > { %591 = vrot.lane.b32.xlu0 %v569_v26, %s1090_s15  ;;  %s1092_s15 = smov 127   ;;  %v617_v26 = vld [vmem:[%s1591_s3 + $0x30] sm:$0xff] }
  0xb3   : > { %v580_v27 = vpop.permute.xlu0 %579 }
  0xb4   : > { %v603_v28 = vsub.f32 %v1328_v46, %v580_v27  ;;  %v584_v31 = vpop.permute.xlu1 %583  ;;  %v676_v27 = vld [vmem:[%s1592_s4 + $0x8] sm:$0xff] }
  0xb5   : > { %v605_v32 = vsub.f32 %v1347_v61, %v584_v31 }
  0xb6   : > { %v619_v29 = vadd.f32 1e-05, %v603_v28 }
  0xb7   : > { %v582_v33 = vpop.permute.xlu0 %581  ;;  %v621_v34 = vadd.f32 1e-05, %v605_v32 }
  0xb8   : > { %1050 = vrsqrt.f32 %v619_v29  ;;  %v604_v35 = vsub.f32 %v1364_v9, %v582_v33 }
  0xb9   : > { %1052 = vrsqrt.f32 %v621_v34  ;;  %v678_v34 = vld [vmem:[%s1592_s4 + $0x18] sm:$0xff] }
  0xba   : > { %v620_v37 = vadd.f32 1e-05, %v604_v35 }
  0xbb   : > { %v586_v38 = vpop.permute.xlu1 %585 }
  0xbc   : > { %1054 = vrsqrt.f32 %v620_v37  ;;  %v606_v39 = vsub.f32 %v1397_v30, %v586_v38  ;;  %v680_v38 = vld [vmem:[%s1592_s4 + $0x28] sm:$0xff] }
  0xbe   : > { %v622_v40 = vadd.f32 1e-05, %v606_v39 }
  0xbf   : > { %v590_v41 = vpop.permute.xlu1 %589 }
  0xc0   : > { %1056 = vrsqrt.f32 %v622_v40  ;;  %v608_v42 = vsub.f32 %v1427_v52, %v590_v41 }
  0xc2   : > { %v1051_v44 = vpop.eup %1050  ;;  %v624_v45 = vadd.f32 1e-05, %v608_v42  ;;  %v682_v42 = vld [vmem:[%s1592_s4 + $0x38] sm:$0xff] }
  0xc3   : > { %643 = vrot.lane.b32.xlu0 %v1051_v44, %s1092_s15  ;;  %v1053_v43 = vpop.eup %1052 }
  0xc4   : > { %1058 = vrsqrt.f32 %v624_v45  ;;  %v588_v47 = vpop.permute.xlu0 %587 }
  0xc5   : > { %v607_v48 = vsub.f32 %v1452_v10, %v588_v47 }
  0xc6   : > { %v1055_v49 = vpop.eup %1054 }
  0xc7   : > { %647 = vrot.lane.b32.xlu0 %v1053_v43, %s1092_s15  ;;  %v623_v50 = vadd.f32 1e-05, %v607_v48  ;;  %645 = vrot.lane.b32.xlu1 %v1055_v49, %s1092_s15 }
  0xc8   : > { %v594_v51 = vpop.permute.xlu1 %593 }
  0xc9   : > { %1060 = vrsqrt.f32 %v623_v50  ;;  %v610_v54 = vsub.f32 %v1464_v21, %v594_v51 }
  0xca   : > { %v1057_v53 = vpop.eup %1056 }
  0xcb   : > { %649 = vrot.lane.b32.xlu1 %v1057_v53, %s1092_s15  ;;  %v626_v55 = vadd.f32 1e-05, %v610_v54 }
  0xcc   : > { %v592_v56 = vpop.permute.xlu0 %591 }
  0xcd   : > { %1062 = vrsqrt.f32 %v626_v55  ;;  %v609_v58 = vsub.f32 %v1469_v25, %v592_v56 }
  0xce   : > { %v1059_v57 = vpop.eup %1058 }
  0xcf   : > { %653 = vrot.lane.b32.xlu1 %v1059_v57, %s1092_s15  ;;  %v625_v59 = vadd.f32 1e-05, %v609_v58 }
  0xd1   : > { %1064 = vrsqrt.f32 %v625_v59 }
  0xd3   : > { %v1061_v60 = vpop.eup %1060 }
  0xd4   : > { %651 = vrot.lane.b32.xlu0 %v1061_v60, %s1092_s15 }
  0xd7   : > { %v1063_v62 = vpop.eup %1062 }
  0xd8   : > { %657 = vrot.lane.b32.xlu1 %v1063_v62, %s1092_s15 }
  0xdb   : > { %v1065_v63 = vpop.eup %1064 }
  0xdc   : > { %655 = vrot.lane.b32.xlu0 %v1065_v63, %s1092_s15  ;;  %s335_s15 = scalar_lea.vmem [#allocation2], %s995_s26 }
  0xdd   : > { %v1018_v55 = vld [vmem:[%s335_s15 + $0x8] sm:$0xff]   ;;  %v1019_v60 = vld [vmem:[%s335_s15 + $0x10] sm:$0xff]  }
  0xde   : > { %v1009_v59 = vunpack.c.h.bf16 %v1018_v55 }
 0x135   : > { %v644_v1 = vpop.permute.xlu0 %643 }
 0x136   : > { %v667_v2 = vmul.f32 %v644_v1, %v611_v0  ;;  %v812_v0 = vld [vmem:[%s1542_s29 + $0x8] sm:$0xff] }
 0x138   : > { %717 = vperm.xlu0 %1048, %v667_v2   ;;  %v683_v29 = vmul.f32 %v667_v2, %v1328_v46  ;;  %v1008_v2 = vunpack.c.l.bf16 %v1018_v55 }
 0x139   : > { %v646_v4 = vpop.permute.xlu1 %645  ;;  %v648_v7 = vpop.permute.xlu0 %647 }
 0x13a   : > { %v668_v5 = vmul.f32 %v646_v4, %v612_v3  ;;  %v669_v12 = vmul.f32 %v648_v7, %v613_v6  ;;  %v1020_v6 = vld [vmem:[%s335_s15 + $0x18] sm:$0xff]  }
 0x13c   : > { %722 = vperm.xlu1 %1049, %v668_v5   ;;  %v684_v23 = vmul.f32 %v668_v5, %v1364_v9  ;;  %v675_v9 = vld [vmem:[%s1592_s4] sm:$0xff]  ;;  %v685_v35 = vmul.f32 %v669_v12, %v1347_v61  ;;  %v1013_v5 = vunpack.c.h.bf16 %v1019_v60 }
 0x13d   : > { %v650_v11 = vpop.permute.xlu1 %649  ;;  %v691_v37 = vsub.f32 %v675_v9, %v683_v29  ;;  %v1016_v9 = vunpack.c.l.bf16 %v1020_v6 }
 0x13e   : > { %v670_v13 = vmul.f32 %v650_v11, %v614_v8  ;;  %v692_v33 = vsub.f32 %v676_v27, %v684_v23  ;;  %v811_v11 = vld [vmem:[%s1542_s29] sm:$0xff] }
 0x140   : > { %732 = vperm.xlu0 %1048, %v670_v13   ;;  %727 = vperm.xlu1 %1049, %v669_v12   ;;  %v686_v31 = vmul.f32 %v670_v13, %v1397_v30  ;;  %v677_v30 = vld [vmem:[%s1592_s4 + $0x10] sm:$0xff]  ;;  %v814_v13 = vld [vmem:[%s1542_s29 + $0x18] sm:$0xff] }
 0x141   : > { %v654_v15 = vpop.permute.xlu1 %653  ;;  %v693_v41 = vsub.f32 %v677_v30, %v685_v35  ;;  %v815_v30 = vld [vmem:[%s1542_s29 + $0x20] sm:$0xff] }
 0x142   : > { %v672_v16 = vmul.f32 %v654_v15, %v616_v14  ;;  %v694_v46 = vsub.f32 %v678_v34, %v686_v31 }
 0x144   : > { %742 = vperm.xlu0 %1048, %v672_v16   ;;  %v688_v36 = vmul.f32 %v672_v16, %v1427_v52  ;;  %v679_v52 = vld [vmem:[%s1592_s4 + $0x20] sm:$0xff] }
 0x146   : > { %v652_v18 = vpop.permute.xlu0 %651  ;;  %v696_v61 = vsub.f32 %v680_v38, %v688_v36 }
 0x147   : > { %v671_v19 = vmul.f32 %v652_v18, %v615_v17  ;;  %v1012_v17 = vunpack.c.l.bf16 %v1019_v60  ;;  %v1017_v18 = vunpack.c.h.bf16 %v1020_v6 }
 0x149   : > { %737 = vperm.xlu1 %1049, %v671_v19   ;;  %v687_v39 = vmul.f32 %v671_v19, %v1452_v10  ;;  %v681_v10 = vld [vmem:[%s1592_s4 + $0x30] sm:$0xff] }
 0x14a   : > { %v658_v22 = vpop.permute.xlu1 %657 }
 0x14b   : > { %v674_v24 = vmul.f32 %v658_v22, %v618_v20  ;;  %v695_v45 = vsub.f32 %v679_v52, %v687_v39  ;;  %v818_v39 = vld [vmem:[%s1542_s29 + $0x38] sm:$0xff] }
 0x14d   : > { %752 = vperm.xlu0 %1048, %v674_v24   ;;  %v690_v40 = vmul.f32 %v674_v24, %v1464_v21 }
 0x14e   : > { %v656_v28 = vpop.permute.xlu0 %655 }
 0x14f   : > { %v673_v32 = vmul.f32 %v656_v28, %v617_v26  ;;  %v698_v43 = vsub.f32 %v682_v42, %v690_v40  ;;  %v813_v26 = vld [vmem:[%s1542_s29 + $0x10] sm:$0xff]  ;;  %v816_v28 = vld [vmem:[%s1542_s29 + $0x28] sm:$0xff] }
 0x151   : > { %747 = vperm.xlu1 %1049, %v673_v32   ;;  %770 = vperm.xlu0 %1048, %v692_v33   ;;  %v689_v44 = vmul.f32 %v673_v32, %v1469_v25  ;;  %v1003_v25 = vld [vmem:[%s335_s15] sm:$0xff]  }
 0x152   : > { %v1005_v54 = vunpack.c.h.bf16 %v1003_v25  ;;  %v1004_v57 = vunpack.c.l.bf16 %v1003_v25 }
 0x153   : > { %v697_v21 = vsub.f32 %v681_v10, %v689_v44  ;;  %v817_v10 = vld [vmem:[%s1542_s29 + $0x30] sm:$0xff] }
 0x155   : > { %765 = vperm.xlu1 %1049, %v691_v37   ;;  %780 = vperm.xlu0 %1048, %v694_v46  }
 0x159   : > { %775 = vperm.xlu1 %1049, %v693_v41   ;;  %790 = vperm.xlu0 %1048, %v696_v61  }
 0x15d   : > { %785 = vperm.xlu1 %1049, %v695_v45   ;;  %800 = vperm.xlu0 %1048, %v698_v43  }
 0x161   : > { %795 = vperm.xlu1 %1049, %v697_v21  }
 0x1b7   : > { %v718_v47 = vpop.permute.xlu0 %717 }
 0x1b8   : > { %v755_v3 = vmul.f32 %v1004_v57, %v718_v47 }
 0x1bb   : > { %v723_v48 = vpop.permute.xlu1 %722 }
 0x1bc   : > { %v756_v58 = vmul.f32 %v1005_v54, %v723_v48 }
 0x1bf   : > { %v733_v49 = vpop.permute.xlu0 %732  ;;  %v728_v50 = vpop.permute.xlu1 %727 }
 0x1c0   : > { %v758_v4 = vmul.f32 %v1009_v59, %v733_v49  ;;  %v757_v19 = vmul.f32 %v1008_v2, %v728_v50 }
 0x1c3   : > { %v743_v51 = vpop.permute.xlu0 %742 }
 0x1c4   : > { %v760_v20 = vmul.f32 %v1013_v5, %v743_v51 }
 0x1c8   : > { %v738_v53 = vpop.permute.xlu1 %737 }
 0x1c9   : > { %v759_v34 = vmul.f32 %v1012_v17, %v738_v53 }
 0x1cc   : > { %v753_v56 = vpop.permute.xlu0 %752 }
 0x1cd   : > { %v762_v35 = vmul.f32 %v1017_v18, %v753_v56 }
 0x1d0   : > { %v748_v62 = vpop.permute.xlu1 %747  ;;  %v771_v63 = vpop.permute.xlu0 %770 }
 0x1d1   : > { %v804_v1 = vadd.f32 %v771_v63, %v756_v58  ;;  %v761_v42 = vmul.f32 %v1016_v9, %v748_v62 }
 0x1d3   : > { %v820_v7 = vadd.f32 %v812_v0, %v804_v1 }
 0x1d4   : > { %v766_v8 = vpop.permute.xlu1 %765  ;;  %v781_v12 = vpop.permute.xlu0 %780 }
 0x1d5   : > { %v803_v14 = vadd.f32 %v766_v8, %v755_v3  ;;  %v828_v15 = vmax.f32 %v820_v7, 0.0  ;;  %v806_v16 = vadd.f32 %v781_v12, %v758_v4 }
 0x1d7   : > { %v819_v22 = vadd.f32 %v811_v11, %v803_v14  ;;  %836 = vst [vmem:[%s1548_s18 + $0x8] sm:$0xff] %v828_v15  ;;  %v822_v23 = vadd.f32 %v814_v13, %v806_v16 }
 0x1d8   : > { %v776_v24 = vpop.permute.xlu1 %775  ;;  %v791_v27 = vpop.permute.xlu0 %790 }
 0x1d9   : > { %v827_v29 = vmax.f32 %v819_v22, 0.0  ;;  %v805_v31 = vadd.f32 %v776_v24, %v757_v19  ;;  %v830_v32 = vmax.f32 %v822_v23, 0.0  ;;  %v808_v33 = vadd.f32 %v791_v27, %v760_v20 }
 0x1db   : > { %835 = vst [vmem:[%s1548_s18] sm:$0xff] %v827_v29  ;;  %v821_v36 = vadd.f32 %v813_v26, %v805_v31  ;;  %838 = vst [vmem:[%s1548_s18 + $0x18] sm:$0xff] %v830_v32  ;;  %v824_v37 = vadd.f32 %v816_v28, %v808_v33 }
 0x1dc   : > { %v786_v46 = vpop.permute.xlu1 %785  ;;  %v801_v38 = vpop.permute.xlu0 %800 }
 0x1dd   : > { %v829_v40 = vmax.f32 %v821_v36, 0.0  ;;  %v807_v41 = vadd.f32 %v786_v46, %v759_v34  ;;  %v832_v61 = vmax.f32 %v824_v37, 0.0  ;;  %v810_v52 = vadd.f32 %v801_v38, %v762_v35 }
 0x1de   : > { %v895_v25 = vld [vmem:[%s1548_s18 + $0x8] sm:$0xff] (%p1157_p5) }
 0x1df   : > { %837 = vst [vmem:[%s1548_s18 + $0x10] sm:$0xff] %v829_v40  ;;  %v823_v44 = vadd.f32 %v815_v30, %v807_v41  ;;  %840 = vst [vmem:[%s1548_s18 + $0x28] sm:$0xff] %v832_v61  ;;  %v826_v45 = vadd.f32 %v818_v39, %v810_v52 }
 0x1e0   : > { %v796_v43 = vpop.permute.xlu1 %795  ;;  %896 = vst [vmem:[%s851_s8 + $0x40] sm:$0xff] (%p1157_p5), %v895_v25 }
 0x1e1   : > { %v831_v21 = vmax.f32 %v823_v44, 0.0  ;;  %v809_v47 = vadd.f32 %v796_v43, %v761_v42  ;;  %v834_v48 = vmax.f32 %v826_v45, 0.0  ;;  %849 = sbr.rel (!%p1157_p5) target bundleno = 496 (0x1f0), region = 123 }
 0x1e2   : > { %v893_v51 = vld [vmem:[%s1548_s18] sm:$0xff] (%p1157_p5)  ;;  %v899_v54 = vld [vmem:[%s1548_s18 + $0x18] sm:$0xff] (%p1157_p5) }
 0x1e3   : > { %839 = vst [vmem:[%s1548_s18 + $0x20] sm:$0xff] %v831_v21  ;;  %v825_v49 = vadd.f32 %v817_v10, %v809_v47  ;;  %842 = vst [vmem:[%s1548_s18 + $0x38] sm:$0xff] %v834_v48 }
 0x1e4   : > { %894 = vst [vmem:[%s851_s8] sm:$0xff] (%p1157_p5), %v893_v51  ;;  %900 = vst [vmem:[%s851_s8 + $0xc0] sm:$0xff] (%p1157_p5), %v899_v54 }
 0x1e5   : > { %v833_v50 = vmax.f32 %v825_v49, 0.0 }
 0x1e6   : > { %v897_v53 = vld [vmem:[%s1548_s18 + $0x10] sm:$0xff] (%p1157_p5)  ;;  %v903_v56 = vld [vmem:[%s1548_s18 + $0x28] sm:$0xff] (%p1157_p5) }
 0x1e7   : > { %841 = vst [vmem:[%s1548_s18 + $0x30] sm:$0xff] %v833_v50  ;;  %898 = vst [vmem:[%s851_s8 + $0x80] sm:$0xff] (%p1157_p5), %v897_v53 }
 0x1e8   : > { %904 = vst [vmem:[%s851_s8 + $0x140] sm:$0xff] %v903_v56 }
 0x1ea   : > { %v901_v55 = vld [vmem:[%s1548_s18 + $0x20] sm:$0xff]  ;;  %v907_v58 = vld [vmem:[%s1548_s18 + $0x38] sm:$0xff] }
 0x1eb   : > { %902 = vst [vmem:[%s851_s8 + $0x100] sm:$0xff] %v901_v55  ;;  %908 = vst [vmem:[%s851_s8 + $0x1c0] sm:$0xff] %v907_v58 }
 0x1ee   : > { %v905_v57 = vld [vmem:[%s1548_s18 + $0x30] sm:$0xff] }
 0x1ef   : > { %906 = vst [vmem:[%s851_s8 + $0x180] sm:$0xff] %v905_v57 }
 0x1f0 PF: > { %p12_p10 = scmp.ge.s32.totalorder %s1140_s22, 10   ;;  %s1596_s18 = smov %s1084_s19 }
 0x1f1   : > { %s1597_s19 = smov %s1151_s25  ;;  %s1598_s20 = smov %s1140_s22 }
 0x1f2   :  { %14 = sbr.rel (!%p12_p10) target bundleno = 2 (0x2), region = 200 }

</bundles_post_ra>
